<compile_context>
chip_gen: v7x
topology: tpu7x:2x2x1
jax: 0.10.0
libtpu: 0.0.40
codegen_flags: <defaults>
</compile_context>

<pallas_src>
import functools
import numpy as np
import jax
import jax.numpy as jnp
from jax import lax
from jax.experimental import pallas as pl
from jax.experimental.pallas import tpu as pltpu

EPS = 1e-6
_NT_DIMS = (((1,), (1,)), ((), ()))          # contract last dims of both operands


def _layernorm(x, alpha, bias):
    # matches reference Norm: alpha * (x - mean) / (std(unbiased) + eps) + bias
    d = x.shape[-1]
    mean = jnp.mean(x, axis=-1, keepdims=True)
    var = jnp.sum((x - mean) ** 2, axis=-1, keepdims=True) / (d - 1)
    std = jnp.sqrt(var)
    return alpha * (x - mean) / (std + EPS) + bias


# ----------------------------- encoder layer kernel -------------------------
def encoder_layer_kernel(x_ref, mask_ref,
                         a1_ref, n1b_ref,
                         wqkv_ref, bqkv_ref,
                         wo_ref, bo_ref,
                         a2_ref, n2b_ref,
                         w1_ref, bf1_ref,
                         w2_ref, bf2_ref,
                         o_ref, *, heads):
    x = x_ref[0]                       # (S, D) f32
    mask = mask_ref[0]                 # (1, S)  1.0 = keep, 0.0 = pad
    S, D = x.shape
    dk = D // heads
    scale = 1.0 / float(np.sqrt(dk))

    # additive mask bias computed once (0 for keep, -1e9 for pad)
    mask_bias = (mask - 1.0) * 1e9     # (1, S) f32

    # ---- multi-head self-attention (pre-norm, residual) ----
    x2 = _layernorm(x, a1_ref[...], n1b_ref[...])
    qkv = jnp.dot(x2.astype(jnp.bfloat16), wqkv_ref[...],
                  preferred_element_type=jnp.float32) + bqkv_ref[...]   # (S, 3D) f32
    wo = wo_ref[...]                   # (D, D) bf16

    attn = None
    for h in range(heads):             # static unroll over heads (heads is small)
        qh = qkv[:, h * dk:(h + 1) * dk].astype(jnp.bfloat16)
        kh = qkv[:, D + h * dk:D + (h + 1) * dk].astype(jnp.bfloat16)
        vh = qkv[:, 2 * D + h * dk:2 * D + (h + 1) * dk].astype(jnp.bfloat16)

        # scores = qh @ kh^T without materializing a transpose
        scores = lax.dot_general(qh, kh, _NT_DIMS,
                                 preferred_element_type=jnp.float32) * scale
        scores = scores + mask_bias                      # (S,S) + (1,S)
        s_max = jnp.max(scores, axis=-1, keepdims=True)
        p = jnp.exp(scores - s_max)
        p = p * pl.reciprocal(jnp.sum(p, axis=-1, keepdims=True), approx=True)

        head_out = jnp.dot(p.astype(jnp.bfloat16), vh,
                           preferred_element_type=jnp.float32)           # (S, dk)
        # concat(head_0..head_H) @ Wo  ==  sum_h head_h @ Wo[h*dk:(h+1)*dk, :]
        contrib = jnp.dot(head_out.astype(jnp.bfloat16),
                          wo[h * dk:(h + 1) * dk, :],
                          preferred_element_type=jnp.float32)            # (S, D)
        attn = contrib if attn is None else attn + contrib

    x = x + attn + bo_ref[...]        # dropout == identity (eval)

    # ---- feed forward (pre-norm, residual) ----
    x2 = _layernorm(x, a2_ref[...], n2b_ref[...])
    h1 = jnp.dot(x2.astype(jnp.bfloat16), w1_ref[...],
                 preferred_element_type=jnp.float32) + bf1_ref[...]
    h1 = jnp.maximum(h1, 0.0)
    ff = jnp.dot(h1.astype(jnp.bfloat16), w2_ref[...],
                 preferred_element_type=jnp.float32) + bf2_ref[...]
    o_ref[0] = x + ff


# grid-invariant (weight/bias) spec; single-buffered if supported
def _const_spec(shape, buffered):
    n = len(shape)
    if buffered:
        return pl.BlockSpec(shape, lambda b: (0,) * n,
                            pipeline_mode=pl.Buffered(1))
    return pl.BlockSpec(shape, lambda b: (0,) * n)


def _encoder_vmem_limit(S, D, d_ff):
    w = 2 * (3 * D * D + D * D + 2 * D * d_ff)          # bf16 weights
    b = 4 * (4 * D + 3 * D + d_ff + 4 * D)              # f32 biases / norm params
    act = 4 * (2 * S * D + 3 * S * D + 2 * S * S + S * d_ff + 4 * S * D)
    est = 2 * (w + b) + 2 * act                          # headroom / double-buffering
    return int(min(max(est, 32 << 20), 120 << 20))


def _encoder_layer_call(x, mask, lp, heads, buffered):
    B, S, D = x.shape
    d_ff = lp["w1"].shape[1]
    cs = functools.partial(_const_spec, buffered=buffered)
    in_specs = [
        pl.BlockSpec((1, S, D), lambda b: (b, 0, 0)),   # x
        pl.BlockSpec((1, 1, S), lambda b: (b, 0, 0)),   # mask
        cs((1, D)), cs((1, D)),                          # norm1 alpha, bias
        cs((D, 3 * D)), cs((1, 3 * D)),                  # fused Wqkv, bqkv
        cs((D, D)), cs((1, D)),                          # Wo, bo
        cs((1, D)), cs((1, D)),                          # norm2 alpha, bias
        cs((D, d_ff)), cs((1, d_ff)),                    # FF W1, b1
        cs((d_ff, D)), cs((1, D)),                       # FF W2, b2
    ]
    return pl.pallas_call(
        functools.partial(encoder_layer_kernel, heads=heads),
        out_shape=jax.ShapeDtypeStruct((B, S, D), jnp.float32),
        grid=(B,),
        in_specs=in_specs,
        out_specs=pl.BlockSpec((1, S, D), lambda b: (b, 0, 0)),
        compiler_params=pltpu.CompilerParams(
            dimension_semantics=("parallel",),
            vmem_limit_bytes=_encoder_vmem_limit(S, D, d_ff)),
    )(x, mask,
      lp["a1"], lp["n1b"],
      lp["wqkv"], lp["bqkv"],
      lp["wo"], lp["bo"],
      lp["a2"], lp["n2b"],
      lp["w1"], lp["bf1"],
      lp["w2"], lp["bf2"])


# -------------------- final norm + mean-pool + output linear ------------------
def head_kernel(x_ref, an_ref, nb_ref, wout_ref, bout_ref, o_ref):
    x = x_ref[0]                                         # (S, D) f32
    xn = _layernorm(x, an_ref[...], nb_ref[...])         # encoder final Norm
    pooled = jnp.mean(xn, axis=0, keepdims=True)         # e_outputs.mean(axis=1)
    # dropout == identity (eval); then self.out linear (lane-dense padded output)
    o_ref[0] = jnp.dot(pooled.astype(jnp.bfloat16), wout_ref[...],
                       preferred_element_type=jnp.float32) + bout_ref[...]


def _transformer_head_call(x, alpha, bias, wout_p, bout_p, n_out, buffered):
    B, S, D = x.shape
    n_pad = wout_p.shape[1]
    cs = functools.partial(_const_spec, buffered=buffered)
    vlim = int(min(max(4 * (2 * S * D * 4 + D * n_pad * 2 + n_pad * 8), 32 << 20),
                   120 << 20))
    out3 = pl.pallas_call(
        head_kernel,
        out_shape=jax.ShapeDtypeStruct((B, 1, n_pad), jnp.float32),
        grid=(B,),
        in_specs=[pl.BlockSpec((1, S, D), lambda b: (b, 0, 0)),
                  cs((1, D)), cs((1, D)),
                  cs((D, n_pad)), cs((1, n_pad))],
        out_specs=pl.BlockSpec((1, 1, n_pad), lambda b: (b, 0, 0)),
        compiler_params=pltpu.CompilerParams(
            dimension_semantics=("parallel",),
            vmem_limit_bytes=vlim),
    )(x, alpha, bias, wout_p, bout_p)
    return out3[:, 0, :n_out]


# fallback in case pl.Buffered(1) is rejected by this Pallas/Mosaic build
_BUFFERED = [True]


def _with_buffered_fallback(fn, *args):
    if _BUFFERED[0]:
        try:
            return fn(*args, True)
        except Exception:
            _BUFFERED[0] = False
    return fn(*args, False)


def encoder_layer(x, mask, lp, heads):
    return _with_buffered_fallback(_encoder_layer_call, x, mask, lp, heads)


def transformer_head(x, alpha, bias, wout_p, bout_p, n_out):
    return _with_buffered_fallback(_transformer_head_call,
                                   x, alpha, bias, wout_p, bout_p, n_out)


# --------------------------------- glue --------------------------------------
def sinusoidal_pe(max_len, d_model):
    pos = np.arange(max_len, dtype=np.float32)[:, None]
    i = np.arange(0, d_model, 2, dtype=np.float32)[None, :]
    angle = pos / np.power(10000.0, i / d_model)
    pe = np.zeros((max_len, d_model), dtype=np.float32)
    pe[:, 0::2] = np.sin(angle)
    pe[:, 1::2] = np.cos(angle)
    return jnp.asarray(pe)


def init_params(key, src_vocab, d_model, d_ff, N, heads, n_out, max_len):
    def linear(k, din, dout):
        kw, kb = jax.random.split(k)
        lim = 1.0 / np.sqrt(din)
        w = jax.random.uniform(kw, (din, dout), jnp.float32, -lim, lim)
        b = jax.random.uniform(kb, (1, dout), jnp.float32, -lim, lim)
        return w, b

    keys = jax.random.split(key, N + 3)
    params = {
        "embed": jax.random.normal(keys[0], (src_vocab, d_model), jnp.float32),
        "pe": sinusoidal_pe(max_len, d_model),
        "norm_a": jnp.ones((1, d_model), jnp.float32),
        "norm_b": jnp.zeros((1, d_model), jnp.float32),
        "n_out": n_out,
    }
    layers = []
    for n in range(N):
        lk = jax.random.split(keys[1 + n], 6)
        wq, bq = linear(lk[0], d_model, d_model)
        wk, bk = linear(lk[1], d_model, d_model)
        wv, bv = linear(lk[2], d_model, d_model)
        wo, bo = linear(lk[3], d_model, d_model)
        w1, bf1 = linear(lk[4], d_model, d_ff)
        w2, bf2 = linear(lk[5], d_ff, d_model)
        layers.append(dict(
            a1=jnp.ones((1, d_model), jnp.float32),
            n1b=jnp.zeros((1, d_model), jnp.float32),
            # fused QKV weight stored bf16 (MXU-native); biases stay f32
            wqkv=jnp.concatenate([wq, wk, wv], axis=1).astype(jnp.bfloat16),
            bqkv=jnp.concatenate([bq, bk, bv], axis=1),
            wo=wo.astype(jnp.bfloat16), bo=bo,
            a2=jnp.ones((1, d_model), jnp.float32),
            n2b=jnp.zeros((1, d_model), jnp.float32),
            w1=w1.astype(jnp.bfloat16), bf1=bf1,
            w2=w2.astype(jnp.bfloat16), bf2=bf2))
    params["layers"] = layers
    wout, bout = linear(keys[-1], d_model, n_out)
    n_pad = ((n_out + 127) // 128) * 128               # lane-dense output slab
    params["wout_p"] = jnp.pad(wout, ((0, 0), (0, n_pad - n_out))).astype(jnp.bfloat16)
    params["bout_p"] = jnp.pad(bout, ((0, 0), (0, n_pad - n_out)))
    return params


def transformer_forward(params, src, src_mask, heads):
    d_model = params["embed"].shape[1]
    S = src.shape[1]
    # Embedding gather + scaled positional encoding (cheap glue, plain JAX).
    x = params["embed"][src] * jnp.sqrt(jnp.float32(d_model)) + params["pe"][:S][None]
    for lp in params["layers"]:
        x = encoder_layer(x, src_mask, lp, heads)
    return transformer_head(x, params["norm_a"], params["norm_b"],
                            params["wout_p"], params["bout_p"], params["n_out"])


if __name__ == "__main__":
    # small, shape-consistent config
    B, S = 2, 8
    src_vocab, d_model, max_len, N, heads, n_out = 16, 32, 8, 2, 4, 4
    d_ff = 64

    key = jax.random.PRNGKey(0)
    kp, ks = jax.random.split(key)
    params = init_params(kp, src_vocab, d_model, d_ff, N, heads, n_out, max_len)

    src = jax.random.randint(ks, (B, S), 0, src_vocab, dtype=jnp.int32)
    src_mask = jnp.ones((B, 1, S), jnp.float32)
    src_mask = src_mask.at[1, 0, S - 2:].set(0.0)   # some padding on batch 1

    out = transformer_forward(params, src, src_mask, heads)
    out = jax.block_until_ready(out)
    assert out.shape == (B, n_out), out.shape
    assert bool(jnp.all(jnp.isfinite(out)))
    print("KERNEL_OK")
</pallas_src>

<mosaic_0001>
module attributes {stable_mosaic.version = 11 : i64} {
  func.func @encoder_layer_kernel(%arg0: i32, %arg1: memref<1x8x32xf32, #tpu.memory_space<vmem>>, %arg2: memref<1x1x8xf32, #tpu.memory_space<vmem>>, %arg3: memref<1x32xf32, #tpu.memory_space<vmem>>, %arg4: memref<1x32xf32, #tpu.memory_space<vmem>>, %arg5: memref<32x96xbf16, #tpu.memory_space<vmem>>, %arg6: memref<1x96xf32, #tpu.memory_space<vmem>>, %arg7: memref<32x32xbf16, #tpu.memory_space<vmem>>, %arg8: memref<1x32xf32, #tpu.memory_space<vmem>>, %arg9: memref<1x32xf32, #tpu.memory_space<vmem>>, %arg10: memref<1x32xf32, #tpu.memory_space<vmem>>, %arg11: memref<32x64xbf16, #tpu.memory_space<vmem>>, %arg12: memref<1x64xf32, #tpu.memory_space<vmem>>, %arg13: memref<64x32xbf16, #tpu.memory_space<vmem>>, %arg14: memref<1x32xf32, #tpu.memory_space<vmem>>, %arg15: memref<1x8x32xf32, #tpu.memory_space<vmem>>) attributes {dimension_semantics = [#tpu.dimension_semantics<parallel>], iteration_bounds = array<i64: 2>, scalar_prefetch = 0 : i64, scratch_operands = 0 : i64, tpu.core_type = #tpu.core_type<tc>, window_params = [{transform_indices = @transform_0, window_bounds = array<i64: 1, 8, 32>}, {transform_indices = @transform_1, window_bounds = array<i64: 1, 1, 8>}, {pipeline_mode = #tpu.pipeline_mode<synchronous>, transform_indices = @transform_2, window_bounds = array<i64: 1, 32>}, {pipeline_mode = #tpu.pipeline_mode<synchronous>, transform_indices = @transform_3, window_bounds = array<i64: 1, 32>}, {pipeline_mode = #tpu.pipeline_mode<synchronous>, transform_indices = @transform_4, window_bounds = array<i64: 32, 96>}, {pipeline_mode = #tpu.pipeline_mode<synchronous>, transform_indices = @transform_5, window_bounds = array<i64: 1, 96>}, {pipeline_mode = #tpu.pipeline_mode<synchronous>, transform_indices = @transform_6, window_bounds = array<i64: 32, 32>}, {pipeline_mode = #tpu.pipeline_mode<synchronous>, transform_indices = @transform_7, window_bounds = array<i64: 1, 32>}, {pipeline_mode = #tpu.pipeline_mode<synchronous>, transform_indices = @transform_8, window_bounds = array<i64: 1, 32>}, {pipeline_mode = #tpu.pipeline_mode<synchronous>, transform_indices = @transform_9, window_bounds = array<i64: 1, 32>}, {pipeline_mode = #tpu.pipeline_mode<synchronous>, transform_indices = @transform_10, window_bounds = array<i64: 32, 64>}, {pipeline_mode = #tpu.pipeline_mode<synchronous>, transform_indices = @transform_11, window_bounds = array<i64: 1, 64>}, {pipeline_mode = #tpu.pipeline_mode<synchronous>, transform_indices = @transform_12, window_bounds = array<i64: 64, 32>}, {pipeline_mode = #tpu.pipeline_mode<synchronous>, transform_indices = @transform_13, window_bounds = array<i64: 1, 32>}, {transform_indices = @transform_14, window_bounds = array<i64: 1, 8, 32>}]} {
    %c0 = arith.constant 0 : index
    %c0_0 = arith.constant 0 : index
    %c0_1 = arith.constant 0 : index
    %0 = vector.load %arg1[%c0, %c0_0, %c0_1] : memref<1x8x32xf32, #tpu.memory_space<vmem>>, vector<1x8x32xf32>
    %1 = vector.shape_cast %0 : vector<1x8x32xf32> to vector<8x32xf32>
    %c0_2 = arith.constant 0 : index
    %c0_3 = arith.constant 0 : index
    %c0_4 = arith.constant 0 : index
    %2 = vector.load %arg2[%c0_2, %c0_3, %c0_4] : memref<1x1x8xf32, #tpu.memory_space<vmem>>, vector<1x1x8xf32>
    %3 = vector.shape_cast %2 : vector<1x1x8xf32> to vector<1x8xf32>
    %cst = arith.constant 1.000000e+00 : f32
    %4 = vector.broadcast %cst : f32 to vector<1x8xf32>
    %5 = arith.subf %3, %4 : vector<1x8xf32>
    %cst_5 = arith.constant 1.000000e+09 : f32
    %6 = vector.broadcast %cst_5 : f32 to vector<1x8xf32>
    %7 = arith.mulf %5, %6 : vector<1x8xf32>
    %c0_6 = arith.constant 0 : index
    %c0_7 = arith.constant 0 : index
    %8 = vector.load %arg3[%c0_6, %c0_7] : memref<1x32xf32, #tpu.memory_space<vmem>>, vector<1x32xf32>
    %c0_8 = arith.constant 0 : index
    %c0_9 = arith.constant 0 : index
    %9 = vector.load %arg4[%c0_8, %c0_9] : memref<1x32xf32, #tpu.memory_space<vmem>>, vector<1x32xf32>
    %cst_10 = arith.constant dense<0.000000e+00> : vector<8xf32>
    %10 = vector.multi_reduction <add>, %1, %cst_10 [1] : vector<8x32xf32> to vector<8xf32>
    %11 = vector.shape_cast %10 : vector<8xf32> to vector<8x1xf32>
    %cst_11 = arith.constant 3.200000e+01 : f32
    %12 = vector.broadcast %cst_11 : f32 to vector<8x1xf32>
    %13 = arith.divf %11, %12 : vector<8x1xf32>
    %14 = vector.broadcast %13 : vector<8x1xf32> to vector<8x32xf32>
    %15 = arith.subf %1, %14 : vector<8x32xf32>
    %16 = arith.mulf %15, %15 : vector<8x32xf32>
    %cst_12 = arith.constant dense<0.000000e+00> : vector<8xf32>
    %17 = vector.multi_reduction <add>, %16, %cst_12 [1] : vector<8x32xf32> to vector<8xf32>
    %18 = vector.shape_cast %17 : vector<8xf32> to vector<8x1xf32>
    %cst_13 = arith.constant 3.100000e+01 : f32
    %19 = vector.broadcast %cst_13 : f32 to vector<8x1xf32>
    %20 = arith.divf %18, %19 : vector<8x1xf32>
    %21 = math.sqrt %20 : vector<8x1xf32>
    %22 = vector.broadcast %13 : vector<8x1xf32> to vector<8x32xf32>
    %23 = arith.subf %1, %22 : vector<8x32xf32>
    %24 = vector.broadcast %8 : vector<1x32xf32> to vector<8x32xf32>
    %25 = arith.mulf %24, %23 : vector<8x32xf32>
    %cst_14 = arith.constant 9.99999997E-7 : f32
    %26 = vector.broadcast %cst_14 : f32 to vector<8x1xf32>
    %27 = arith.addf %21, %26 : vector<8x1xf32>
    %28 = vector.broadcast %27 : vector<8x1xf32> to vector<8x32xf32>
    %29 = arith.divf %25, %28 : vector<8x32xf32>
    %30 = vector.broadcast %9 : vector<1x32xf32> to vector<8x32xf32>
    %31 = arith.addf %29, %30 : vector<8x32xf32>
    %32 = arith.truncf %31 : vector<8x32xf32> to vector<8x32xbf16>
    %c0_15 = arith.constant 0 : index
    %c0_16 = arith.constant 0 : index
    %33 = vector.load %arg5[%c0_15, %c0_16] : memref<32x96xbf16, #tpu.memory_space<vmem>>, vector<32x96xbf16>
    %cst_17 = arith.constant dense<0.000000e+00> : vector<8x96xf32>
    %34 = tpu.matmul %32, %33, %cst_17 {dimension_numbers = #tpu.dot_dimension_numbers<[1], [0], [0], [1], [0, 0, 1, 1], [], []>} : vector<8x32xbf16>, vector<32x96xbf16>, vector<8x96xf32> -> vector<8x96xf32>
    %c0_18 = arith.constant 0 : index
    %c0_19 = arith.constant 0 : index
    %35 = vector.load %arg6[%c0_18, %c0_19] : memref<1x96xf32, #tpu.memory_space<vmem>>, vector<1x96xf32>
    %36 = vector.broadcast %35 : vector<1x96xf32> to vector<8x96xf32>
    %37 = arith.addf %34, %36 : vector<8x96xf32>
    %c0_20 = arith.constant 0 : index
    %c0_21 = arith.constant 0 : index
    %38 = vector.load %arg7[%c0_20, %c0_21] : memref<32x32xbf16, #tpu.memory_space<vmem>>, vector<32x32xbf16>
    %39 = vector.extract_strided_slice %37 {offsets = [0, 0], sizes = [8, 8], strides = [1, 1]} : vector<8x96xf32> to vector<8x8xf32>
    %40 = arith.truncf %39 : vector<8x8xf32> to vector<8x8xbf16>
    %41 = vector.extract_strided_slice %37 {offsets = [0, 32], sizes = [8, 8], strides = [1, 1]} : vector<8x96xf32> to vector<8x8xf32>
    %42 = arith.truncf %41 : vector<8x8xf32> to vector<8x8xbf16>
    %43 = vector.extract_strided_slice %37 {offsets = [0, 64], sizes = [8, 8], strides = [1, 1]} : vector<8x96xf32> to vector<8x8xf32>
    %44 = arith.truncf %43 : vector<8x8xf32> to vector<8x8xbf16>
    %cst_22 = arith.constant dense<0.000000e+00> : vector<8x8xf32>
    %45 = tpu.matmul %40, %42, %cst_22 {dimension_numbers = #tpu.dot_dimension_numbers<[1], [1], [0], [0], [0, 0, 1, 0], [], []>} : vector<8x8xbf16>, vector<8x8xbf16>, vector<8x8xf32> -> vector<8x8xf32>
    %cst_23 = arith.constant 0.353553385 : f32
    %46 = vector.broadcast %cst_23 : f32 to vector<8x8xf32>
    %47 = arith.mulf %45, %46 : vector<8x8xf32>
    %48 = vector.broadcast %7 : vector<1x8xf32> to vector<8x8xf32>
    %49 = arith.addf %47, %48 : vector<8x8xf32>
    %cst_24 = arith.constant dense<0xFF800000> : vector<8xf32>
    %50 = vector.multi_reduction <maximumf>, %49, %cst_24 [1] : vector<8x8xf32> to vector<8xf32>
    %51 = vector.shape_cast %50 : vector<8xf32> to vector<8x1xf32>
    %52 = vector.broadcast %51 : vector<8x1xf32> to vector<8x8xf32>
    %53 = arith.subf %49, %52 : vector<8x8xf32>
    %54 = math.exp %53 : vector<8x8xf32>
    %cst_25 = arith.constant dense<0.000000e+00> : vector<8xf32>
    %55 = vector.multi_reduction <add>, %54, %cst_25 [1] : vector<8x8xf32> to vector<8xf32>
    %56 = vector.shape_cast %55 : vector<8xf32> to vector<8x1xf32>
    %57 = tpu.reciprocal %56 {approx = true} : vector<8x1xf32> -> vector<8x1xf32>
    %58 = vector.broadcast %57 : vector<8x1xf32> to vector<8x8xf32>
    %59 = arith.mulf %54, %58 : vector<8x8xf32>
    %60 = arith.truncf %59 : vector<8x8xf32> to vector<8x8xbf16>
    %cst_26 = arith.constant dense<0.000000e+00> : vector<8x8xf32>
    %61 = tpu.matmul %60, %44, %cst_26 {dimension_numbers = #tpu.dot_dimension_numbers<[1], [0], [0], [1], [0, 0, 1, 1], [], []>} : vector<8x8xbf16>, vector<8x8xbf16>, vector<8x8xf32> -> vector<8x8xf32>
    %62 = arith.truncf %61 : vector<8x8xf32> to vector<8x8xbf16>
    %63 = vector.extract_strided_slice %38 {offsets = [0, 0], sizes = [8, 32], strides = [1, 1]} : vector<32x32xbf16> to vector<8x32xbf16>
    %cst_27 = arith.constant dense<0.000000e+00> : vector<8x32xf32>
    %64 = tpu.matmul %62, %63, %cst_27 {dimension_numbers = #tpu.dot_dimension_numbers<[1], [0], [0], [1], [0, 0, 1, 1], [], []>} : vector<8x8xbf16>, vector<8x32xbf16>, vector<8x32xf32> -> vector<8x32xf32>
    %65 = vector.extract_strided_slice %37 {offsets = [0, 8], sizes = [8, 8], strides = [1, 1]} : vector<8x96xf32> to vector<8x8xf32>
    %66 = arith.truncf %65 : vector<8x8xf32> to vector<8x8xbf16>
    %67 = vector.extract_strided_slice %37 {offsets = [0, 40], sizes = [8, 8], strides = [1, 1]} : vector<8x96xf32> to vector<8x8xf32>
    %68 = arith.truncf %67 : vector<8x8xf32> to vector<8x8xbf16>
    %69 = vector.extract_strided_slice %37 {offsets = [0, 72], sizes = [8, 8], strides = [1, 1]} : vector<8x96xf32> to vector<8x8xf32>
    %70 = arith.truncf %69 : vector<8x8xf32> to vector<8x8xbf16>
    %cst_28 = arith.constant dense<0.000000e+00> : vector<8x8xf32>
    %71 = tpu.matmul %66, %68, %cst_28 {dimension_numbers = #tpu.dot_dimension_numbers<[1], [1], [0], [0], [0, 0, 1, 0], [], []>} : vector<8x8xbf16>, vector<8x8xbf16>, vector<8x8xf32> -> vector<8x8xf32>
    %cst_29 = arith.constant 0.353553385 : f32
    %72 = vector.broadcast %cst_29 : f32 to vector<8x8xf32>
    %73 = arith.mulf %71, %72 : vector<8x8xf32>
    %74 = vector.broadcast %7 : vector<1x8xf32> to vector<8x8xf32>
    %75 = arith.addf %73, %74 : vector<8x8xf32>
    %cst_30 = arith.constant dense<0xFF800000> : vector<8xf32>
    %76 = vector.multi_reduction <maximumf>, %75, %cst_30 [1] : vector<8x8xf32> to vector<8xf32>
    %77 = vector.shape_cast %76 : vector<8xf32> to vector<8x1xf32>
    %78 = vector.broadcast %77 : vector<8x1xf32> to vector<8x8xf32>
    %79 = arith.subf %75, %78 : vector<8x8xf32>
    %80 = math.exp %79 : vector<8x8xf32>
    %cst_31 = arith.constant dense<0.000000e+00> : vector<8xf32>
    %81 = vector.multi_reduction <add>, %80, %cst_31 [1] : vector<8x8xf32> to vector<8xf32>
    %82 = vector.shape_cast %81 : vector<8xf32> to vector<8x1xf32>
    %83 = tpu.reciprocal %82 {approx = true} : vector<8x1xf32> -> vector<8x1xf32>
    %84 = vector.broadcast %83 : vector<8x1xf32> to vector<8x8xf32>
    %85 = arith.mulf %80, %84 : vector<8x8xf32>
    %86 = arith.truncf %85 : vector<8x8xf32> to vector<8x8xbf16>
    %cst_32 = arith.constant dense<0.000000e+00> : vector<8x8xf32>
    %87 = tpu.matmul %86, %70, %cst_32 {dimension_numbers = #tpu.dot_dimension_numbers<[1], [0], [0], [1], [0, 0, 1, 1], [], []>} : vector<8x8xbf16>, vector<8x8xbf16>, vector<8x8xf32> -> vector<8x8xf32>
    %88 = arith.truncf %87 : vector<8x8xf32> to vector<8x8xbf16>
    %89 = vector.extract_strided_slice %38 {offsets = [8, 0], sizes = [8, 32], strides = [1, 1]} : vector<32x32xbf16> to vector<8x32xbf16>
    %cst_33 = arith.constant dense<0.000000e+00> : vector<8x32xf32>
    %90 = tpu.matmul %88, %89, %cst_33 {dimension_numbers = #tpu.dot_dimension_numbers<[1], [0], [0], [1], [0, 0, 1, 1], [], []>} : vector<8x8xbf16>, vector<8x32xbf16>, vector<8x32xf32> -> vector<8x32xf32>
    %91 = arith.addf %64, %90 : vector<8x32xf32>
    %92 = vector.extract_strided_slice %37 {offsets = [0, 16], sizes = [8, 8], strides = [1, 1]} : vector<8x96xf32> to vector<8x8xf32>
    %93 = arith.truncf %92 : vector<8x8xf32> to vector<8x8xbf16>
    %94 = vector.extract_strided_slice %37 {offsets = [0, 48], sizes = [8, 8], strides = [1, 1]} : vector<8x96xf32> to vector<8x8xf32>
    %95 = arith.truncf %94 : vector<8x8xf32> to vector<8x8xbf16>
    %96 = vector.extract_strided_slice %37 {offsets = [0, 80], sizes = [8, 8], strides = [1, 1]} : vector<8x96xf32> to vector<8x8xf32>
    %97 = arith.truncf %96 : vector<8x8xf32> to vector<8x8xbf16>
    %cst_34 = arith.constant dense<0.000000e+00> : vector<8x8xf32>
    %98 = tpu.matmul %93, %95, %cst_34 {dimension_numbers = #tpu.dot_dimension_numbers<[1], [1], [0], [0], [0, 0, 1, 0], [], []>} : vector<8x8xbf16>, vector<8x8xbf16>, vector<8x8xf32> -> vector<8x8xf32>
    %cst_35 = arith.constant 0.353553385 : f32
    %99 = vector.broadcast %cst_35 : f32 to vector<8x8xf32>
    %100 = arith.mulf %98, %99 : vector<8x8xf32>
    %101 = vector.broadcast %7 : vector<1x8xf32> to vector<8x8xf32>
    %102 = arith.addf %100, %101 : vector<8x8xf32>
    %cst_36 = arith.constant dense<0xFF800000> : vector<8xf32>
    %103 = vector.multi_reduction <maximumf>, %102, %cst_36 [1] : vector<8x8xf32> to vector<8xf32>
    %104 = vector.shape_cast %103 : vector<8xf32> to vector<8x1xf32>
    %105 = vector.broadcast %104 : vector<8x1xf32> to vector<8x8xf32>
    %106 = arith.subf %102, %105 : vector<8x8xf32>
    %107 = math.exp %106 : vector<8x8xf32>
    %cst_37 = arith.constant dense<0.000000e+00> : vector<8xf32>
    %108 = vector.multi_reduction <add>, %107, %cst_37 [1] : vector<8x8xf32> to vector<8xf32>
    %109 = vector.shape_cast %108 : vector<8xf32> to vector<8x1xf32>
    %110 = tpu.reciprocal %109 {approx = true} : vector<8x1xf32> -> vector<8x1xf32>
    %111 = vector.broadcast %110 : vector<8x1xf32> to vector<8x8xf32>
    %112 = arith.mulf %107, %111 : vector<8x8xf32>
    %113 = arith.truncf %112 : vector<8x8xf32> to vector<8x8xbf16>
    %cst_38 = arith.constant dense<0.000000e+00> : vector<8x8xf32>
    %114 = tpu.matmul %113, %97, %cst_38 {dimension_numbers = #tpu.dot_dimension_numbers<[1], [0], [0], [1], [0, 0, 1, 1], [], []>} : vector<8x8xbf16>, vector<8x8xbf16>, vector<8x8xf32> -> vector<8x8xf32>
    %115 = arith.truncf %114 : vector<8x8xf32> to vector<8x8xbf16>
    %116 = vector.extract_strided_slice %38 {offsets = [16, 0], sizes = [8, 32], strides = [1, 1]} : vector<32x32xbf16> to vector<8x32xbf16>
    %cst_39 = arith.constant dense<0.000000e+00> : vector<8x32xf32>
    %117 = tpu.matmul %115, %116, %cst_39 {dimension_numbers = #tpu.dot_dimension_numbers<[1], [0], [0], [1], [0, 0, 1, 1], [], []>} : vector<8x8xbf16>, vector<8x32xbf16>, vector<8x32xf32> -> vector<8x32xf32>
    %118 = arith.addf %91, %117 : vector<8x32xf32>
    %119 = vector.extract_strided_slice %37 {offsets = [0, 24], sizes = [8, 8], strides = [1, 1]} : vector<8x96xf32> to vector<8x8xf32>
    %120 = arith.truncf %119 : vector<8x8xf32> to vector<8x8xbf16>
    %121 = vector.extract_strided_slice %37 {offsets = [0, 56], sizes = [8, 8], strides = [1, 1]} : vector<8x96xf32> to vector<8x8xf32>
    %122 = arith.truncf %121 : vector<8x8xf32> to vector<8x8xbf16>
    %123 = vector.extract_strided_slice %37 {offsets = [0, 88], sizes = [8, 8], strides = [1, 1]} : vector<8x96xf32> to vector<8x8xf32>
    %124 = arith.truncf %123 : vector<8x8xf32> to vector<8x8xbf16>
    %cst_40 = arith.constant dense<0.000000e+00> : vector<8x8xf32>
    %125 = tpu.matmul %120, %122, %cst_40 {dimension_numbers = #tpu.dot_dimension_numbers<[1], [1], [0], [0], [0, 0, 1, 0], [], []>} : vector<8x8xbf16>, vector<8x8xbf16>, vector<8x8xf32> -> vector<8x8xf32>
    %cst_41 = arith.constant 0.353553385 : f32
    %126 = vector.broadcast %cst_41 : f32 to vector<8x8xf32>
    %127 = arith.mulf %125, %126 : vector<8x8xf32>
    %128 = vector.broadcast %7 : vector<1x8xf32> to vector<8x8xf32>
    %129 = arith.addf %127, %128 : vector<8x8xf32>
    %cst_42 = arith.constant dense<0xFF800000> : vector<8xf32>
    %130 = vector.multi_reduction <maximumf>, %129, %cst_42 [1] : vector<8x8xf32> to vector<8xf32>
    %131 = vector.shape_cast %130 : vector<8xf32> to vector<8x1xf32>
    %132 = vector.broadcast %131 : vector<8x1xf32> to vector<8x8xf32>
    %133 = arith.subf %129, %132 : vector<8x8xf32>
    %134 = math.exp %133 : vector<8x8xf32>
    %cst_43 = arith.constant dense<0.000000e+00> : vector<8xf32>
    %135 = vector.multi_reduction <add>, %134, %cst_43 [1] : vector<8x8xf32> to vector<8xf32>
    %136 = vector.shape_cast %135 : vector<8xf32> to vector<8x1xf32>
    %137 = tpu.reciprocal %136 {approx = true} : vector<8x1xf32> -> vector<8x1xf32>
    %138 = vector.broadcast %137 : vector<8x1xf32> to vector<8x8xf32>
    %139 = arith.mulf %134, %138 : vector<8x8xf32>
    %140 = arith.truncf %139 : vector<8x8xf32> to vector<8x8xbf16>
    %cst_44 = arith.constant dense<0.000000e+00> : vector<8x8xf32>
    %141 = tpu.matmul %140, %124, %cst_44 {dimension_numbers = #tpu.dot_dimension_numbers<[1], [0], [0], [1], [0, 0, 1, 1], [], []>} : vector<8x8xbf16>, vector<8x8xbf16>, vector<8x8xf32> -> vector<8x8xf32>
    %142 = arith.truncf %141 : vector<8x8xf32> to vector<8x8xbf16>
    %143 = vector.extract_strided_slice %38 {offsets = [24, 0], sizes = [8, 32], strides = [1, 1]} : vector<32x32xbf16> to vector<8x32xbf16>
    %cst_45 = arith.constant dense<0.000000e+00> : vector<8x32xf32>
    %144 = tpu.matmul %142, %143, %cst_45 {dimension_numbers = #tpu.dot_dimension_numbers<[1], [0], [0], [1], [0, 0, 1, 1], [], []>} : vector<8x8xbf16>, vector<8x32xbf16>, vector<8x32xf32> -> vector<8x32xf32>
    %145 = arith.addf %118, %144 : vector<8x32xf32>
    %146 = arith.addf %1, %145 : vector<8x32xf32>
    %c0_46 = arith.constant 0 : index
    %c0_47 = arith.constant 0 : index
    %147 = vector.load %arg8[%c0_46, %c0_47] : memref<1x32xf32, #tpu.memory_space<vmem>>, vector<1x32xf32>
    %148 = vector.broadcast %147 : vector<1x32xf32> to vector<8x32xf32>
    %149 = arith.addf %146, %148 : vector<8x32xf32>
    %c0_48 = arith.constant 0 : index
    %c0_49 = arith.constant 0 : index
    %150 = vector.load %arg9[%c0_48, %c0_49] : memref<1x32xf32, #tpu.memory_space<vmem>>, vector<1x32xf32>
    %c0_50 = arith.constant 0 : index
    %c0_51 = arith.constant 0 : index
    %151 = vector.load %arg10[%c0_50, %c0_51] : memref<1x32xf32, #tpu.memory_space<vmem>>, vector<1x32xf32>
    %cst_52 = arith.constant dense<0.000000e+00> : vector<8xf32>
    %152 = vector.multi_reduction <add>, %149, %cst_52 [1] : vector<8x32xf32> to vector<8xf32>
    %153 = vector.shape_cast %152 : vector<8xf32> to vector<8x1xf32>
    %cst_53 = arith.constant 3.200000e+01 : f32
    %154 = vector.broadcast %cst_53 : f32 to vector<8x1xf32>
    %155 = arith.divf %153, %154 : vector<8x1xf32>
    %156 = vector.broadcast %155 : vector<8x1xf32> to vector<8x32xf32>
    %157 = arith.subf %149, %156 : vector<8x32xf32>
    %158 = arith.mulf %157, %157 : vector<8x32xf32>
    %cst_54 = arith.constant dense<0.000000e+00> : vector<8xf32>
    %159 = vector.multi_reduction <add>, %158, %cst_54 [1] : vector<8x32xf32> to vector<8xf32>
    %160 = vector.shape_cast %159 : vector<8xf32> to vector<8x1xf32>
    %cst_55 = arith.constant 3.100000e+01 : f32
    %161 = vector.broadcast %cst_55 : f32 to vector<8x1xf32>
    %162 = arith.divf %160, %161 : vector<8x1xf32>
    %163 = math.sqrt %162 : vector<8x1xf32>
    %164 = vector.broadcast %155 : vector<8x1xf32> to vector<8x32xf32>
    %165 = arith.subf %149, %164 : vector<8x32xf32>
    %166 = vector.broadcast %150 : vector<1x32xf32> to vector<8x32xf32>
    %167 = arith.mulf %166, %165 : vector<8x32xf32>
    %cst_56 = arith.constant 9.99999997E-7 : f32
    %168 = vector.broadcast %cst_56 : f32 to vector<8x1xf32>
    %169 = arith.addf %163, %168 : vector<8x1xf32>
    %170 = vector.broadcast %169 : vector<8x1xf32> to vector<8x32xf32>
    %171 = arith.divf %167, %170 : vector<8x32xf32>
    %172 = vector.broadcast %151 : vector<1x32xf32> to vector<8x32xf32>
    %173 = arith.addf %171, %172 : vector<8x32xf32>
    %174 = arith.truncf %173 : vector<8x32xf32> to vector<8x32xbf16>
    %c0_57 = arith.constant 0 : index
    %c0_58 = arith.constant 0 : index
    %175 = vector.load %arg11[%c0_57, %c0_58] : memref<32x64xbf16, #tpu.memory_space<vmem>>, vector<32x64xbf16>
    %cst_59 = arith.constant dense<0.000000e+00> : vector<8x64xf32>
    %176 = tpu.matmul %174, %175, %cst_59 {dimension_numbers = #tpu.dot_dimension_numbers<[1], [0], [0], [1], [0, 0, 1, 1], [], []>} : vector<8x32xbf16>, vector<32x64xbf16>, vector<8x64xf32> -> vector<8x64xf32>
    %c0_60 = arith.constant 0 : index
    %c0_61 = arith.constant 0 : index
    %177 = vector.load %arg12[%c0_60, %c0_61] : memref<1x64xf32, #tpu.memory_space<vmem>>, vector<1x64xf32>
    %178 = vector.broadcast %177 : vector<1x64xf32> to vector<8x64xf32>
    %179 = arith.addf %176, %178 : vector<8x64xf32>
    %cst_62 = arith.constant 0.000000e+00 : f32
    %180 = vector.broadcast %cst_62 : f32 to vector<8x64xf32>
    %181 = arith.maximumf %179, %180 : vector<8x64xf32>
    %182 = arith.truncf %181 : vector<8x64xf32> to vector<8x64xbf16>
    %c0_63 = arith.constant 0 : index
    %c0_64 = arith.constant 0 : index
    %183 = vector.load %arg13[%c0_63, %c0_64] : memref<64x32xbf16, #tpu.memory_space<vmem>>, vector<64x32xbf16>
    %cst_65 = arith.constant dense<0.000000e+00> : vector<8x32xf32>
    %184 = tpu.matmul %182, %183, %cst_65 {dimension_numbers = #tpu.dot_dimension_numbers<[1], [0], [0], [1], [0, 0, 1, 1], [], []>} : vector<8x64xbf16>, vector<64x32xbf16>, vector<8x32xf32> -> vector<8x32xf32>
    %c0_66 = arith.constant 0 : index
    %c0_67 = arith.constant 0 : index
    %185 = vector.load %arg14[%c0_66, %c0_67] : memref<1x32xf32, #tpu.memory_space<vmem>>, vector<1x32xf32>
    %186 = vector.broadcast %185 : vector<1x32xf32> to vector<8x32xf32>
    %187 = arith.addf %184, %186 : vector<8x32xf32>
    %188 = arith.addf %149, %187 : vector<8x32xf32>
    %c0_68 = arith.constant 0 : index
    %c0_69 = arith.constant 0 : index
    %c0_70 = arith.constant 0 : index
    %189 = vector.load %arg15[%c0_68, %c0_69, %c0_70] : memref<1x8x32xf32, #tpu.memory_space<vmem>>, vector<1x8x32xf32>
    %190 = vector.shape_cast %189 : vector<1x8x32xf32> to vector<8x32xf32>
    %191 = vector.shape_cast %188 : vector<8x32xf32> to vector<1x8x32xf32>
    tpu.vector_store %arg15[%c0_68, %c0_69, %c0_70], %191 {strides = array<i32>} : memref<1x8x32xf32, #tpu.memory_space<vmem>>, vector<1x8x32xf32>,
    return
  }
  func.func @transform_0(%arg0: i32) -> (i32, i32, i32) {
    %c0_i32 = arith.constant 0 : i32
    %c0_i32_0 = arith.constant 0 : i32
    %c0_i32_1 = arith.constant 0 : i32
    return %arg0, %c0_i32, %c0_i32_0 : i32, i32, i32
  }
  func.func @transform_1(%arg0: i32) -> (i32, i32, i32) {
    %c0_i32 = arith.constant 0 : i32
    %c0_i32_0 = arith.constant 0 : i32
    %c0_i32_1 = arith.constant 0 : i32
    return %arg0, %c0_i32, %c0_i32_0 : i32, i32, i32
  }
  func.func @transform_2(%arg0: i32) -> (i32, i32) {
    %c0_i32 = arith.constant 0 : i32
    %c0_i32_0 = arith.constant 0 : i32
    %c0_i32_1 = arith.constant 0 : i32
    return %c0_i32, %c0_i32_0 : i32, i32
  }
  func.func @transform_3(%arg0: i32) -> (i32, i32) {
    %c0_i32 = arith.constant 0 : i32
    %c0_i32_0 = arith.constant 0 : i32
    %c0_i32_1 = arith.constant 0 : i32
    return %c0_i32, %c0_i32_0 : i32, i32
  }
  func.func @transform_4(%arg0: i32) -> (i32, i32) {
    %c0_i32 = arith.constant 0 : i32
    %c0_i32_0 = arith.constant 0 : i32
    %c0_i32_1 = arith.constant 0 : i32
    return %c0_i32, %c0_i32_0 : i32, i32
  }
  func.func @transform_5(%arg0: i32) -> (i32, i32) {
    %c0_i32 = arith.constant 0 : i32
    %c0_i32_0 = arith.constant 0 : i32
    %c0_i32_1 = arith.constant 0 : i32
    return %c0_i32, %c0_i32_0 : i32, i32
  }
  func.func @transform_6(%arg0: i32) -> (i32, i32) {
    %c0_i32 = arith.constant 0 : i32
    %c0_i32_0 = arith.constant 0 : i32
    %c0_i32_1 = arith.constant 0 : i32
    return %c0_i32, %c0_i32_0 : i32, i32
  }
  func.func @transform_7(%arg0: i32) -> (i32, i32) {
    %c0_i32 = arith.constant 0 : i32
    %c0_i32_0 = arith.constant 0 : i32
    %c0_i32_1 = arith.constant 0 : i32
    return %c0_i32, %c0_i32_0 : i32, i32
  }
  func.func @transform_8(%arg0: i32) -> (i32, i32) {
    %c0_i32 = arith.constant 0 : i32
    %c0_i32_0 = arith.constant 0 : i32
    %c0_i32_1 = arith.constant 0 : i32
    return %c0_i32, %c0_i32_0 : i32, i32
  }
  func.func @transform_9(%arg0: i32) -> (i32, i32) {
    %c0_i32 = arith.constant 0 : i32
    %c0_i32_0 = arith.constant 0 : i32
    %c0_i32_1 = arith.constant 0 : i32
    return %c0_i32, %c0_i32_0 : i32, i32
  }
  func.func @transform_10(%arg0: i32) -> (i32, i32) {
    %c0_i32 = arith.constant 0 : i32
    %c0_i32_0 = arith.constant 0 : i32
    %c0_i32_1 = arith.constant 0 : i32
    return %c0_i32, %c0_i32_0 : i32, i32
  }
  func.func @transform_11(%arg0: i32) -> (i32, i32) {
    %c0_i32 = arith.constant 0 : i32
    %c0_i32_0 = arith.constant 0 : i32
    %c0_i32_1 = arith.constant 0 : i32
    return %c0_i32, %c0_i32_0 : i32, i32
  }
  func.func @transform_12(%arg0: i32) -> (i32, i32) {
    %c0_i32 = arith.constant 0 : i32
    %c0_i32_0 = arith.constant 0 : i32
    %c0_i32_1 = arith.constant 0 : i32
    return %c0_i32, %c0_i32_0 : i32, i32
  }
  func.func @transform_13(%arg0: i32) -> (i32, i32) {
    %c0_i32 = arith.constant 0 : i32
    %c0_i32_0 = arith.constant 0 : i32
    %c0_i32_1 = arith.constant 0 : i32
    return %c0_i32, %c0_i32_0 : i32, i32
  }
  func.func @transform_14(%arg0: i32) -> (i32, i32, i32) {
    %c0_i32 = arith.constant 0 : i32
    %c0_i32_0 = arith.constant 0 : i32
    %c0_i32_1 = arith.constant 0 : i32
    return %arg0, %c0_i32, %c0_i32_0 : i32, i32, i32
  }
}

module attributes {stable_mosaic.version = 11 : i64} {
  func.func @encoder_layer_kernel(%arg0: i32, %arg1: memref<1x8x32xf32, #tpu.memory_space<vmem>>, %arg2: memref<1x1x8xf32, #tpu.memory_space<vmem>>, %arg3: memref<1x32xf32, #tpu.memory_space<vmem>>, %arg4: memref<1x32xf32, #tpu.memory_space<vmem>>, %arg5: memref<32x96xbf16, #tpu.memory_space<vmem>>, %arg6: memref<1x96xf32, #tpu.memory_space<vmem>>, %arg7: memref<32x32xbf16, #tpu.memory_space<vmem>>, %arg8: memref<1x32xf32, #tpu.memory_space<vmem>>, %arg9: memref<1x32xf32, #tpu.memory_space<vmem>>, %arg10: memref<1x32xf32, #tpu.memory_space<vmem>>, %arg11: memref<32x64xbf16, #tpu.memory_space<vmem>>, %arg12: memref<1x64xf32, #tpu.memory_space<vmem>>, %arg13: memref<64x32xbf16, #tpu.memory_space<vmem>>, %arg14: memref<1x32xf32, #tpu.memory_space<vmem>>, %arg15: memref<1x8x32xf32, #tpu.memory_space<vmem>>) attributes {dimension_semantics = [#tpu.dimension_semantics<parallel>], iteration_bounds = array<i64: 2>, scalar_prefetch = 0 : i64, scratch_operands = 0 : i64, tpu.core_type = #tpu.core_type<tc>, window_params = [{transform_indices = @transform_0, window_bounds = array<i64: 1, 8, 32>}, {transform_indices = @transform_1, window_bounds = array<i64: 1, 1, 8>}, {pipeline_mode = #tpu.pipeline_mode<synchronous>, transform_indices = @transform_2, window_bounds = array<i64: 1, 32>}, {pipeline_mode = #tpu.pipeline_mode<synchronous>, transform_indices = @transform_3, window_bounds = array<i64: 1, 32>}, {pipeline_mode = #tpu.pipeline_mode<synchronous>, transform_indices = @transform_4, window_bounds = array<i64: 32, 96>}, {pipeline_mode = #tpu.pipeline_mode<synchronous>, transform_indices = @transform_5, window_bounds = array<i64: 1, 96>}, {pipeline_mode = #tpu.pipeline_mode<synchronous>, transform_indices = @transform_6, window_bounds = array<i64: 32, 32>}, {pipeline_mode = #tpu.pipeline_mode<synchronous>, transform_indices = @transform_7, window_bounds = array<i64: 1, 32>}, {pipeline_mode = #tpu.pipeline_mode<synchronous>, transform_indices = @transform_8, window_bounds = array<i64: 1, 32>}, {pipeline_mode = #tpu.pipeline_mode<synchronous>, transform_indices = @transform_9, window_bounds = array<i64: 1, 32>}, {pipeline_mode = #tpu.pipeline_mode<synchronous>, transform_indices = @transform_10, window_bounds = array<i64: 32, 64>}, {pipeline_mode = #tpu.pipeline_mode<synchronous>, transform_indices = @transform_11, window_bounds = array<i64: 1, 64>}, {pipeline_mode = #tpu.pipeline_mode<synchronous>, transform_indices = @transform_12, window_bounds = array<i64: 64, 32>}, {pipeline_mode = #tpu.pipeline_mode<synchronous>, transform_indices = @transform_13, window_bounds = array<i64: 1, 32>}, {transform_indices = @transform_14, window_bounds = array<i64: 1, 8, 32>}]} {
    %c0 = arith.constant 0 : index
    %c0_0 = arith.constant 0 : index
    %c0_1 = arith.constant 0 : index
    %0 = vector.load %arg1[%c0, %c0_0, %c0_1] : memref<1x8x32xf32, #tpu.memory_space<vmem>>, vector<1x8x32xf32>
    %1 = vector.shape_cast %0 : vector<1x8x32xf32> to vector<8x32xf32>
    %c0_2 = arith.constant 0 : index
    %c0_3 = arith.constant 0 : index
    %c0_4 = arith.constant 0 : index
    %2 = vector.load %arg2[%c0_2, %c0_3, %c0_4] : memref<1x1x8xf32, #tpu.memory_space<vmem>>, vector<1x1x8xf32>
    %3 = vector.shape_cast %2 : vector<1x1x8xf32> to vector<1x8xf32>
    %cst = arith.constant 1.000000e+00 : f32
    %4 = vector.broadcast %cst : f32 to vector<1x8xf32>
    %5 = arith.subf %3, %4 : vector<1x8xf32>
    %cst_5 = arith.constant 1.000000e+09 : f32
    %6 = vector.broadcast %cst_5 : f32 to vector<1x8xf32>
    %7 = arith.mulf %5, %6 : vector<1x8xf32>
    %c0_6 = arith.constant 0 : index
    %c0_7 = arith.constant 0 : index
    %8 = vector.load %arg3[%c0_6, %c0_7] : memref<1x32xf32, #tpu.memory_space<vmem>>, vector<1x32xf32>
    %c0_8 = arith.constant 0 : index
    %c0_9 = arith.constant 0 : index
    %9 = vector.load %arg4[%c0_8, %c0_9] : memref<1x32xf32, #tpu.memory_space<vmem>>, vector<1x32xf32>
    %cst_10 = arith.constant dense<0.000000e+00> : vector<8xf32>
    %10 = vector.multi_reduction <add>, %1, %cst_10 [1] : vector<8x32xf32> to vector<8xf32>
    %11 = vector.shape_cast %10 : vector<8xf32> to vector<8x1xf32>
    %cst_11 = arith.constant 3.200000e+01 : f32
    %12 = vector.broadcast %cst_11 : f32 to vector<8x1xf32>
    %13 = arith.divf %11, %12 : vector<8x1xf32>
    %14 = vector.broadcast %13 : vector<8x1xf32> to vector<8x32xf32>
    %15 = arith.subf %1, %14 : vector<8x32xf32>
    %16 = arith.mulf %15, %15 : vector<8x32xf32>
    %cst_12 = arith.constant dense<0.000000e+00> : vector<8xf32>
    %17 = vector.multi_reduction <add>, %16, %cst_12 [1] : vector<8x32xf32> to vector<8xf32>
    %18 = vector.shape_cast %17 : vector<8xf32> to vector<8x1xf32>
    %cst_13 = arith.constant 3.100000e+01 : f32
    %19 = vector.broadcast %cst_13 : f32 to vector<8x1xf32>
    %20 = arith.divf %18, %19 : vector<8x1xf32>
    %21 = math.sqrt %20 : vector<8x1xf32>
    %22 = vector.broadcast %13 : vector<8x1xf32> to vector<8x32xf32>
    %23 = arith.subf %1, %22 : vector<8x32xf32>
    %24 = vector.broadcast %8 : vector<1x32xf32> to vector<8x32xf32>
    %25 = arith.mulf %24, %23 : vector<8x32xf32>
    %cst_14 = arith.constant 9.99999997E-7 : f32
    %26 = vector.broadcast %cst_14 : f32 to vector<8x1xf32>
    %27 = arith.addf %21, %26 : vector<8x1xf32>
    %28 = vector.broadcast %27 : vector<8x1xf32> to vector<8x32xf32>
    %29 = arith.divf %25, %28 : vector<8x32xf32>
    %30 = vector.broadcast %9 : vector<1x32xf32> to vector<8x32xf32>
    %31 = arith.addf %29, %30 : vector<8x32xf32>
    %32 = arith.truncf %31 : vector<8x32xf32> to vector<8x32xbf16>
    %c0_15 = arith.constant 0 : index
    %c0_16 = arith.constant 0 : index
    %33 = vector.load %arg5[%c0_15, %c0_16] : memref<32x96xbf16, #tpu.memory_space<vmem>>, vector<32x96xbf16>
    %cst_17 = arith.constant dense<0.000000e+00> : vector<8x96xf32>
    %34 = tpu.matmul %32, %33, %cst_17 {dimension_numbers = #tpu.dot_dimension_numbers<[1], [0], [0], [1], [0, 0, 1, 1], [], []>} : vector<8x32xbf16>, vector<32x96xbf16>, vector<8x96xf32> -> vector<8x96xf32>
    %c0_18 = arith.constant 0 : index
    %c0_19 = arith.constant 0 : index
    %35 = vector.load %arg6[%c0_18, %c0_19] : memref<1x96xf32, #tpu.memory_space<vmem>>, vector<1x96xf32>
    %36 = vector.broadcast %35 : vector<1x96xf32> to vector<8x96xf32>
    %37 = arith.addf %34, %36 : vector<8x96xf32>
    %c0_20 = arith.constant 0 : index
    %c0_21 = arith.constant 0 : index
    %38 = vector.load %arg7[%c0_20, %c0_21] : memref<32x32xbf16, #tpu.memory_space<vmem>>, vector<32x32xbf16>
    %39 = vector.extract_strided_slice %37 {offsets = [0, 0], sizes = [8, 8], strides = [1, 1]} : vector<8x96xf32> to vector<8x8xf32>
    %40 = arith.truncf %39 : vector<8x8xf32> to vector<8x8xbf16>
    %41 = vector.extract_strided_slice %37 {offsets = [0, 32], sizes = [8, 8], strides = [1, 1]} : vector<8x96xf32> to vector<8x8xf32>
    %42 = arith.truncf %41 : vector<8x8xf32> to vector<8x8xbf16>
    %43 = vector.extract_strided_slice %37 {offsets = [0, 64], sizes = [8, 8], strides = [1, 1]} : vector<8x96xf32> to vector<8x8xf32>
    %44 = arith.truncf %43 : vector<8x8xf32> to vector<8x8xbf16>
    %cst_22 = arith.constant dense<0.000000e+00> : vector<8x8xf32>
    %45 = tpu.matmul %40, %42, %cst_22 {dimension_numbers = #tpu.dot_dimension_numbers<[1], [1], [0], [0], [0, 0, 1, 0], [], []>} : vector<8x8xbf16>, vector<8x8xbf16>, vector<8x8xf32> -> vector<8x8xf32>
    %cst_23 = arith.constant 0.353553385 : f32
    %46 = vector.broadcast %cst_23 : f32 to vector<8x8xf32>
    %47 = arith.mulf %45, %46 : vector<8x8xf32>
    %48 = vector.broadcast %7 : vector<1x8xf32> to vector<8x8xf32>
    %49 = arith.addf %47, %48 : vector<8x8xf32>
    %cst_24 = arith.constant dense<0xFF800000> : vector<8xf32>
    %50 = vector.multi_reduction <maximumf>, %49, %cst_24 [1] : vector<8x8xf32> to vector<8xf32>
    %51 = vector.shape_cast %50 : vector<8xf32> to vector<8x1xf32>
    %52 = vector.broadcast %51 : vector<8x1xf32> to vector<8x8xf32>
    %53 = arith.subf %49, %52 : vector<8x8xf32>
    %54 = math.exp %53 : vector<8x8xf32>
    %cst_25 = arith.constant dense<0.000000e+00> : vector<8xf32>
    %55 = vector.multi_reduction <add>, %54, %cst_25 [1] : vector<8x8xf32> to vector<8xf32>
    %56 = vector.shape_cast %55 : vector<8xf32> to vector<8x1xf32>
    %57 = tpu.reciprocal %56 {approx = true} : vector<8x1xf32> -> vector<8x1xf32>
    %58 = vector.broadcast %57 : vector<8x1xf32> to vector<8x8xf32>
    %59 = arith.mulf %54, %58 : vector<8x8xf32>
    %60 = arith.truncf %59 : vector<8x8xf32> to vector<8x8xbf16>
    %cst_26 = arith.constant dense<0.000000e+00> : vector<8x8xf32>
    %61 = tpu.matmul %60, %44, %cst_26 {dimension_numbers = #tpu.dot_dimension_numbers<[1], [0], [0], [1], [0, 0, 1, 1], [], []>} : vector<8x8xbf16>, vector<8x8xbf16>, vector<8x8xf32> -> vector<8x8xf32>
    %62 = arith.truncf %61 : vector<8x8xf32> to vector<8x8xbf16>
    %63 = vector.extract_strided_slice %38 {offsets = [0, 0], sizes = [8, 32], strides = [1, 1]} : vector<32x32xbf16> to vector<8x32xbf16>
    %cst_27 = arith.constant dense<0.000000e+00> : vector<8x32xf32>
    %64 = tpu.matmul %62, %63, %cst_27 {dimension_numbers = #tpu.dot_dimension_numbers<[1], [0], [0], [1], [0, 0, 1, 1], [], []>} : vector<8x8xbf16>, vector<8x32xbf16>, vector<8x32xf32> -> vector<8x32xf32>
    %65 = vector.extract_strided_slice %37 {offsets = [0, 8], sizes = [8, 8], strides = [1, 1]} : vector<8x96xf32> to vector<8x8xf32>
    %66 = arith.truncf %65 : vector<8x8xf32> to vector<8x8xbf16>
    %67 = vector.extract_strided_slice %37 {offsets = [0, 40], sizes = [8, 8], strides = [1, 1]} : vector<8x96xf32> to vector<8x8xf32>
    %68 = arith.truncf %67 : vector<8x8xf32> to vector<8x8xbf16>
    %69 = vector.extract_strided_slice %37 {offsets = [0, 72], sizes = [8, 8], strides = [1, 1]} : vector<8x96xf32> to vector<8x8xf32>
    %70 = arith.truncf %69 : vector<8x8xf32> to vector<8x8xbf16>
    %cst_28 = arith.constant dense<0.000000e+00> : vector<8x8xf32>
    %71 = tpu.matmul %66, %68, %cst_28 {dimension_numbers = #tpu.dot_dimension_numbers<[1], [1], [0], [0], [0, 0, 1, 0], [], []>} : vector<8x8xbf16>, vector<8x8xbf16>, vector<8x8xf32> -> vector<8x8xf32>
    %cst_29 = arith.constant 0.353553385 : f32
    %72 = vector.broadcast %cst_29 : f32 to vector<8x8xf32>
    %73 = arith.mulf %71, %72 : vector<8x8xf32>
    %74 = vector.broadcast %7 : vector<1x8xf32> to vector<8x8xf32>
    %75 = arith.addf %73, %74 : vector<8x8xf32>
    %cst_30 = arith.constant dense<0xFF800000> : vector<8xf32>
    %76 = vector.multi_reduction <maximumf>, %75, %cst_30 [1] : vector<8x8xf32> to vector<8xf32>
    %77 = vector.shape_cast %76 : vector<8xf32> to vector<8x1xf32>
    %78 = vector.broadcast %77 : vector<8x1xf32> to vector<8x8xf32>
    %79 = arith.subf %75, %78 : vector<8x8xf32>
    %80 = math.exp %79 : vector<8x8xf32>
    %cst_31 = arith.constant dense<0.000000e+00> : vector<8xf32>
    %81 = vector.multi_reduction <add>, %80, %cst_31 [1] : vector<8x8xf32> to vector<8xf32>
    %82 = vector.shape_cast %81 : vector<8xf32> to vector<8x1xf32>
    %83 = tpu.reciprocal %82 {approx = true} : vector<8x1xf32> -> vector<8x1xf32>
    %84 = vector.broadcast %83 : vector<8x1xf32> to vector<8x8xf32>
    %85 = arith.mulf %80, %84 : vector<8x8xf32>
    %86 = arith.truncf %85 : vector<8x8xf32> to vector<8x8xbf16>
    %cst_32 = arith.constant dense<0.000000e+00> : vector<8x8xf32>
    %87 = tpu.matmul %86, %70, %cst_32 {dimension_numbers = #tpu.dot_dimension_numbers<[1], [0], [0], [1], [0, 0, 1, 1], [], []>} : vector<8x8xbf16>, vector<8x8xbf16>, vector<8x8xf32> -> vector<8x8xf32>
    %88 = arith.truncf %87 : vector<8x8xf32> to vector<8x8xbf16>
    %89 = vector.extract_strided_slice %38 {offsets = [8, 0], sizes = [8, 32], strides = [1, 1]} : vector<32x32xbf16> to vector<8x32xbf16>
    %cst_33 = arith.constant dense<0.000000e+00> : vector<8x32xf32>
    %90 = tpu.matmul %88, %89, %cst_33 {dimension_numbers = #tpu.dot_dimension_numbers<[1], [0], [0], [1], [0, 0, 1, 1], [], []>} : vector<8x8xbf16>, vector<8x32xbf16>, vector<8x32xf32> -> vector<8x32xf32>
    %91 = arith.addf %64, %90 : vector<8x32xf32>
    %92 = vector.extract_strided_slice %37 {offsets = [0, 16], sizes = [8, 8], strides = [1, 1]} : vector<8x96xf32> to vector<8x8xf32>
    %93 = arith.truncf %92 : vector<8x8xf32> to vector<8x8xbf16>
    %94 = vector.extract_strided_slice %37 {offsets = [0, 48], sizes = [8, 8], strides = [1, 1]} : vector<8x96xf32> to vector<8x8xf32>
    %95 = arith.truncf %94 : vector<8x8xf32> to vector<8x8xbf16>
    %96 = vector.extract_strided_slice %37 {offsets = [0, 80], sizes = [8, 8], strides = [1, 1]} : vector<8x96xf32> to vector<8x8xf32>
    %97 = arith.truncf %96 : vector<8x8xf32> to vector<8x8xbf16>
    %cst_34 = arith.constant dense<0.000000e+00> : vector<8x8xf32>
    %98 = tpu.matmul %93, %95, %cst_34 {dimension_numbers = #tpu.dot_dimension_numbers<[1], [1], [0], [0], [0, 0, 1, 0], [], []>} : vector<8x8xbf16>, vector<8x8xbf16>, vector<8x8xf32> -> vector<8x8xf32>
    %cst_35 = arith.constant 0.353553385 : f32
    %99 = vector.broadcast %cst_35 : f32 to vector<8x8xf32>
    %100 = arith.mulf %98, %99 : vector<8x8xf32>
    %101 = vector.broadcast %7 : vector<1x8xf32> to vector<8x8xf32>
    %102 = arith.addf %100, %101 : vector<8x8xf32>
    %cst_36 = arith.constant dense<0xFF800000> : vector<8xf32>
    %103 = vector.multi_reduction <maximumf>, %102, %cst_36 [1] : vector<8x8xf32> to vector<8xf32>
    %104 = vector.shape_cast %103 : vector<8xf32> to vector<8x1xf32>
    %105 = vector.broadcast %104 : vector<8x1xf32> to vector<8x8xf32>
    %106 = arith.subf %102, %105 : vector<8x8xf32>
    %107 = math.exp %106 : vector<8x8xf32>
    %cst_37 = arith.constant dense<0.000000e+00> : vector<8xf32>
    %108 = vector.multi_reduction <add>, %107, %cst_37 [1] : vector<8x8xf32> to vector<8xf32>
    %109 = vector.shape_cast %108 : vector<8xf32> to vector<8x1xf32>
    %110 = tpu.reciprocal %109 {approx = true} : vector<8x1xf32> -> vector<8x1xf32>
    %111 = vector.broadcast %110 : vector<8x1xf32> to vector<8x8xf32>
    %112 = arith.mulf %107, %111 : vector<8x8xf32>
    %113 = arith.truncf %112 : vector<8x8xf32> to vector<8x8xbf16>
    %cst_38 = arith.constant dense<0.000000e+00> : vector<8x8xf32>
    %114 = tpu.matmul %113, %97, %cst_38 {dimension_numbers = #tpu.dot_dimension_numbers<[1], [0], [0], [1], [0, 0, 1, 1], [], []>} : vector<8x8xbf16>, vector<8x8xbf16>, vector<8x8xf32> -> vector<8x8xf32>
    %115 = arith.truncf %114 : vector<8x8xf32> to vector<8x8xbf16>
    %116 = vector.extract_strided_slice %38 {offsets = [16, 0], sizes = [8, 32], strides = [1, 1]} : vector<32x32xbf16> to vector<8x32xbf16>
    %cst_39 = arith.constant dense<0.000000e+00> : vector<8x32xf32>
    %117 = tpu.matmul %115, %116, %cst_39 {dimension_numbers = #tpu.dot_dimension_numbers<[1], [0], [0], [1], [0, 0, 1, 1], [], []>} : vector<8x8xbf16>, vector<8x32xbf16>, vector<8x32xf32> -> vector<8x32xf32>
    %118 = arith.addf %91, %117 : vector<8x32xf32>
    %119 = vector.extract_strided_slice %37 {offsets = [0, 24], sizes = [8, 8], strides = [1, 1]} : vector<8x96xf32> to vector<8x8xf32>
    %120 = arith.truncf %119 : vector<8x8xf32> to vector<8x8xbf16>
    %121 = vector.extract_strided_slice %37 {offsets = [0, 56], sizes = [8, 8], strides = [1, 1]} : vector<8x96xf32> to vector<8x8xf32>
    %122 = arith.truncf %121 : vector<8x8xf32> to vector<8x8xbf16>
    %123 = vector.extract_strided_slice %37 {offsets = [0, 88], sizes = [8, 8], strides = [1, 1]} : vector<8x96xf32> to vector<8x8xf32>
    %124 = arith.truncf %123 : vector<8x8xf32> to vector<8x8xbf16>
    %cst_40 = arith.constant dense<0.000000e+00> : vector<8x8xf32>
    %125 = tpu.matmul %120, %122, %cst_40 {dimension_numbers = #tpu.dot_dimension_numbers<[1], [1], [0], [0], [0, 0, 1, 0], [], []>} : vector<8x8xbf16>, vector<8x8xbf16>, vector<8x8xf32> -> vector<8x8xf32>
    %cst_41 = arith.constant 0.353553385 : f32
    %126 = vector.broadcast %cst_41 : f32 to vector<8x8xf32>
    %127 = arith.mulf %125, %126 : vector<8x8xf32>
    %128 = vector.broadcast %7 : vector<1x8xf32> to vector<8x8xf32>
    %129 = arith.addf %127, %128 : vector<8x8xf32>
    %cst_42 = arith.constant dense<0xFF800000> : vector<8xf32>
    %130 = vector.multi_reduction <maximumf>, %129, %cst_42 [1] : vector<8x8xf32> to vector<8xf32>
    %131 = vector.shape_cast %130 : vector<8xf32> to vector<8x1xf32>
    %132 = vector.broadcast %131 : vector<8x1xf32> to vector<8x8xf32>
    %133 = arith.subf %129, %132 : vector<8x8xf32>
    %134 = math.exp %133 : vector<8x8xf32>
    %cst_43 = arith.constant dense<0.000000e+00> : vector<8xf32>
    %135 = vector.multi_reduction <add>, %134, %cst_43 [1] : vector<8x8xf32> to vector<8xf32>
    %136 = vector.shape_cast %135 : vector<8xf32> to vector<8x1xf32>
    %137 = tpu.reciprocal %136 {approx = true} : vector<8x1xf32> -> vector<8x1xf32>
    %138 = vector.broadcast %137 : vector<8x1xf32> to vector<8x8xf32>
    %139 = arith.mulf %134, %138 : vector<8x8xf32>
    %140 = arith.truncf %139 : vector<8x8xf32> to vector<8x8xbf16>
    %cst_44 = arith.constant dense<0.000000e+00> : vector<8x8xf32>
    %141 = tpu.matmul %140, %124, %cst_44 {dimension_numbers = #tpu.dot_dimension_numbers<[1], [0], [0], [1], [0, 0, 1, 1], [], []>} : vector<8x8xbf16>, vector<8x8xbf16>, vector<8x8xf32> -> vector<8x8xf32>
    %142 = arith.truncf %141 : vector<8x8xf32> to vector<8x8xbf16>
    %143 = vector.extract_strided_slice %38 {offsets = [24, 0], sizes = [8, 32], strides = [1, 1]} : vector<32x32xbf16> to vector<8x32xbf16>
    %cst_45 = arith.constant dense<0.000000e+00> : vector<8x32xf32>
    %144 = tpu.matmul %142, %143, %cst_45 {dimension_numbers = #tpu.dot_dimension_numbers<[1], [0], [0], [1], [0, 0, 1, 1], [], []>} : vector<8x8xbf16>, vector<8x32xbf16>, vector<8x32xf32> -> vector<8x32xf32>
    %145 = arith.addf %118, %144 : vector<8x32xf32>
    %146 = arith.addf %1, %145 : vector<8x32xf32>
    %c0_46 = arith.constant 0 : index
    %c0_47 = arith.constant 0 : index
    %147 = vector.load %arg8[%c0_46, %c0_47] : memref<1x32xf32, #tpu.memory_space<vmem>>, vector<1x32xf32>
    %148 = vector.broadcast %147 : vector<1x32xf32> to vector<8x32xf32>
    %149 = arith.addf %146, %148 : vector<8x32xf32>
    %c0_48 = arith.constant 0 : index
    %c0_49 = arith.constant 0 : index
    %150 = vector.load %arg9[%c0_48, %c0_49] : memref<1x32xf32, #tpu.memory_space<vmem>>, vector<1x32xf32>
    %c0_50 = arith.constant 0 : index
    %c0_51 = arith.constant 0 : index
    %151 = vector.load %arg10[%c0_50, %c0_51] : memref<1x32xf32, #tpu.memory_space<vmem>>, vector<1x32xf32>
    %cst_52 = arith.constant dense<0.000000e+00> : vector<8xf32>
    %152 = vector.multi_reduction <add>, %149, %cst_52 [1] : vector<8x32xf32> to vector<8xf32>
    %153 = vector.shape_cast %152 : vector<8xf32> to vector<8x1xf32>
    %cst_53 = arith.constant 3.200000e+01 : f32
    %154 = vector.broadcast %cst_53 : f32 to vector<8x1xf32>
    %155 = arith.divf %153, %154 : vector<8x1xf32>
    %156 = vector.broadcast %155 : vector<8x1xf32> to vector<8x32xf32>
    %157 = arith.subf %149, %156 : vector<8x32xf32>
    %158 = arith.mulf %157, %157 : vector<8x32xf32>
    %cst_54 = arith.constant dense<0.000000e+00> : vector<8xf32>
    %159 = vector.multi_reduction <add>, %158, %cst_54 [1] : vector<8x32xf32> to vector<8xf32>
    %160 = vector.shape_cast %159 : vector<8xf32> to vector<8x1xf32>
    %cst_55 = arith.constant 3.100000e+01 : f32
    %161 = vector.broadcast %cst_55 : f32 to vector<8x1xf32>
    %162 = arith.divf %160, %161 : vector<8x1xf32>
    %163 = math.sqrt %162 : vector<8x1xf32>
    %164 = vector.broadcast %155 : vector<8x1xf32> to vector<8x32xf32>
    %165 = arith.subf %149, %164 : vector<8x32xf32>
    %166 = vector.broadcast %150 : vector<1x32xf32> to vector<8x32xf32>
    %167 = arith.mulf %166, %165 : vector<8x32xf32>
    %cst_56 = arith.constant 9.99999997E-7 : f32
    %168 = vector.broadcast %cst_56 : f32 to vector<8x1xf32>
    %169 = arith.addf %163, %168 : vector<8x1xf32>
    %170 = vector.broadcast %169 : vector<8x1xf32> to vector<8x32xf32>
    %171 = arith.divf %167, %170 : vector<8x32xf32>
    %172 = vector.broadcast %151 : vector<1x32xf32> to vector<8x32xf32>
    %173 = arith.addf %171, %172 : vector<8x32xf32>
    %174 = arith.truncf %173 : vector<8x32xf32> to vector<8x32xbf16>
    %c0_57 = arith.constant 0 : index
    %c0_58 = arith.constant 0 : index
    %175 = vector.load %arg11[%c0_57, %c0_58] : memref<32x64xbf16, #tpu.memory_space<vmem>>, vector<32x64xbf16>
    %cst_59 = arith.constant dense<0.000000e+00> : vector<8x64xf32>
    %176 = tpu.matmul %174, %175, %cst_59 {dimension_numbers = #tpu.dot_dimension_numbers<[1], [0], [0], [1], [0, 0, 1, 1], [], []>} : vector<8x32xbf16>, vector<32x64xbf16>, vector<8x64xf32> -> vector<8x64xf32>
    %c0_60 = arith.constant 0 : index
    %c0_61 = arith.constant 0 : index
    %177 = vector.load %arg12[%c0_60, %c0_61] : memref<1x64xf32, #tpu.memory_space<vmem>>, vector<1x64xf32>
    %178 = vector.broadcast %177 : vector<1x64xf32> to vector<8x64xf32>
    %179 = arith.addf %176, %178 : vector<8x64xf32>
    %cst_62 = arith.constant 0.000000e+00 : f32
    %180 = vector.broadcast %cst_62 : f32 to vector<8x64xf32>
    %181 = arith.maximumf %179, %180 : vector<8x64xf32>
    %182 = arith.truncf %181 : vector<8x64xf32> to vector<8x64xbf16>
    %c0_63 = arith.constant 0 : index
    %c0_64 = arith.constant 0 : index
    %183 = vector.load %arg13[%c0_63, %c0_64] : memref<64x32xbf16, #tpu.memory_space<vmem>>, vector<64x32xbf16>
    %cst_65 = arith.constant dense<0.000000e+00> : vector<8x32xf32>
    %184 = tpu.matmul %182, %183, %cst_65 {dimension_numbers = #tpu.dot_dimension_numbers<[1], [0], [0], [1], [0, 0, 1, 1], [], []>} : vector<8x64xbf16>, vector<64x32xbf16>, vector<8x32xf32> -> vector<8x32xf32>
    %c0_66 = arith.constant 0 : index
    %c0_67 = arith.constant 0 : index
    %185 = vector.load %arg14[%c0_66, %c0_67] : memref<1x32xf32, #tpu.memory_space<vmem>>, vector<1x32xf32>
    %186 = vector.broadcast %185 : vector<1x32xf32> to vector<8x32xf32>
    %187 = arith.addf %184, %186 : vector<8x32xf32>
    %188 = arith.addf %149, %187 : vector<8x32xf32>
    %c0_68 = arith.constant 0 : index
    %c0_69 = arith.constant 0 : index
    %c0_70 = arith.constant 0 : index
    %189 = vector.load %arg15[%c0_68, %c0_69, %c0_70] : memref<1x8x32xf32, #tpu.memory_space<vmem>>, vector<1x8x32xf32>
    %190 = vector.shape_cast %189 : vector<1x8x32xf32> to vector<8x32xf32>
    %191 = vector.shape_cast %188 : vector<8x32xf32> to vector<1x8x32xf32>
    tpu.vector_store %arg15[%c0_68, %c0_69, %c0_70], %191 {strides = array<i32>} : memref<1x8x32xf32, #tpu.memory_space<vmem>>, vector<1x8x32xf32>,
    return
  }
  func.func @transform_0(%arg0: i32) -> (i32, i32, i32) {
    %c0_i32 = arith.constant 0 : i32
    %c0_i32_0 = arith.constant 0 : i32
    %c0_i32_1 = arith.constant 0 : i32
    return %arg0, %c0_i32, %c0_i32_0 : i32, i32, i32
  }
  func.func @transform_1(%arg0: i32) -> (i32, i32, i32) {
    %c0_i32 = arith.constant 0 : i32
    %c0_i32_0 = arith.constant 0 : i32
    %c0_i32_1 = arith.constant 0 : i32
    return %arg0, %c0_i32, %c0_i32_0 : i32, i32, i32
  }
  func.func @transform_2(%arg0: i32) -> (i32, i32) {
    %c0_i32 = arith.constant 0 : i32
    %c0_i32_0 = arith.constant 0 : i32
    %c0_i32_1 = arith.constant 0 : i32
    return %c0_i32, %c0_i32_0 : i32, i32
  }
  func.func @transform_3(%arg0: i32) -> (i32, i32) {
    %c0_i32 = arith.constant 0 : i32
    %c0_i32_0 = arith.constant 0 : i32
    %c0_i32_1 = arith.constant 0 : i32
    return %c0_i32, %c0_i32_0 : i32, i32
  }
  func.func @transform_4(%arg0: i32) -> (i32, i32) {
    %c0_i32 = arith.constant 0 : i32
    %c0_i32_0 = arith.constant 0 : i32
    %c0_i32_1 = arith.constant 0 : i32
    return %c0_i32, %c0_i32_0 : i32, i32
  }
  func.func @transform_5(%arg0: i32) -> (i32, i32) {
    %c0_i32 = arith.constant 0 : i32
    %c0_i32_0 = arith.constant 0 : i32
    %c0_i32_1 = arith.constant 0 : i32
    return %c0_i32, %c0_i32_0 : i32, i32
  }
  func.func @transform_6(%arg0: i32) -> (i32, i32) {
    %c0_i32 = arith.constant 0 : i32
    %c0_i32_0 = arith.constant 0 : i32
    %c0_i32_1 = arith.constant 0 : i32
    return %c0_i32, %c0_i32_0 : i32, i32
  }
  func.func @transform_7(%arg0: i32) -> (i32, i32) {
    %c0_i32 = arith.constant 0 : i32
    %c0_i32_0 = arith.constant 0 : i32
    %c0_i32_1 = arith.constant 0 : i32
    return %c0_i32, %c0_i32_0 : i32, i32
  }
  func.func @transform_8(%arg0: i32) -> (i32, i32) {
    %c0_i32 = arith.constant 0 : i32
    %c0_i32_0 = arith.constant 0 : i32
    %c0_i32_1 = arith.constant 0 : i32
    return %c0_i32, %c0_i32_0 : i32, i32
  }
  func.func @transform_9(%arg0: i32) -> (i32, i32) {
    %c0_i32 = arith.constant 0 : i32
    %c0_i32_0 = arith.constant 0 : i32
    %c0_i32_1 = arith.constant 0 : i32
    return %c0_i32, %c0_i32_0 : i32, i32
  }
  func.func @transform_10(%arg0: i32) -> (i32, i32) {
    %c0_i32 = arith.constant 0 : i32
    %c0_i32_0 = arith.constant 0 : i32
    %c0_i32_1 = arith.constant 0 : i32
    return %c0_i32, %c0_i32_0 : i32, i32
  }
  func.func @transform_11(%arg0: i32) -> (i32, i32) {
    %c0_i32 = arith.constant 0 : i32
    %c0_i32_0 = arith.constant 0 : i32
    %c0_i32_1 = arith.constant 0 : i32
    return %c0_i32, %c0_i32_0 : i32, i32
  }
  func.func @transform_12(%arg0: i32) -> (i32, i32) {
    %c0_i32 = arith.constant 0 : i32
    %c0_i32_0 = arith.constant 0 : i32
    %c0_i32_1 = arith.constant 0 : i32
    return %c0_i32, %c0_i32_0 : i32, i32
  }
  func.func @transform_13(%arg0: i32) -> (i32, i32) {
    %c0_i32 = arith.constant 0 : i32
    %c0_i32_0 = arith.constant 0 : i32
    %c0_i32_1 = arith.constant 0 : i32
    return %c0_i32, %c0_i32_0 : i32, i32
  }
  func.func @transform_14(%arg0: i32) -> (i32, i32, i32) {
    %c0_i32 = arith.constant 0 : i32
    %c0_i32_0 = arith.constant 0 : i32
    %c0_i32_1 = arith.constant 0 : i32
    return %arg0, %c0_i32, %c0_i32_0 : i32, i32, i32
  }
}

</mosaic_0001>

<bundles_post_ra>
// kernel: tpu_custom_call.1
= control target key start
LH: loop header
LB: loop body
LE: loop exit
PB: predicated region body
PF: predicated region fallthrough
CT: control target
= control target key end

     0   :  { %s2764_s0 = inlined_call_operand.vmem [shape: f32[2,8,32], index: 0, kind: input, shape index: {}]   ;;  %s2765_s1 = inlined_call_operand.vmem [shape: f32[2,1,8], index: 1, kind: input, shape index: {}]   ;;  %s2766_s2 = inlined_call_operand.hbm [shape: f32[1,32], index: 2, kind: input, shape index: {}]   ;;  %s2767_s3 = inlined_call_operand.hbm [shape: f32[1,32], index: 3, kind: input, shape index: {}]   ;;  %s2768_s4 = inlined_call_operand.vmem [shape: bf16[32,96], index: 4, kind: input, shape index: {}]   ;;  %s2769_s5 = inlined_call_operand.hbm [shape: f32[1,96], index: 5, kind: input, shape index: {}]   ;;  %s2770_s6 = inlined_call_operand.vmem [shape: bf16[32,32], index: 6, kind: input, shape index: {}]   ;;  %s2771_s7 = inlined_call_operand.hbm [shape: f32[1,32], index: 7, kind: input, shape index: {}]   ;;  %s2772_s8 = inlined_call_operand.hbm [shape: f32[1,32], index: 8, kind: input, shape index: {}]   ;;  %s2773_s9 = inlined_call_operand.hbm [shape: f32[1,32], index: 9, kind: input, shape index: {}]   ;;  %s2774_s10 = inlined_call_operand.vmem [shape: bf16[32,64], index: 10, kind: input, shape index: {}]   ;;  %s2775_s11 = inlined_call_operand.vmem [shape: f32[1,64], index: 11, kind: input, shape index: {}]   ;;  %s2776_s12 = inlined_call_operand.vmem [shape: bf16[64,32], index: 12, kind: input, shape index: {}]   ;;  %s2777_s13 = inlined_call_operand.vmem [shape: f32[1,32], index: 13, kind: input, shape index: {}]   ;;  %s2778_s14 = inlined_call_operand.hbm [shape: f32[2,8,32], index: 14, kind: output, shape index: {}]  }
   0x1   :  { %2791 = sst [smem:[#allocation26_spill]] %s2767_s3 }
   0x2   :  { %2792 = sst [smem:[#allocation27_spill]] %s2778_s14 }
   0x3   :  { %19 = vsyncpa [#allocation3], 0 }
   0x4   :  { %20 = vsyncpa [#allocation6], 0 }
   0x5   :  { %21 = vsyncpa [#allocation9], 0 }
   0x6   :  { %22 = vsyncpa [#allocation12], 0 }
   0x7   :  { %23 = vsyncpa [#allocation4], 0 }
   0x8   :  { %25 = vsyncpa [#allocation4 + $0x1], 0  ;;  %s2332_s29 = smov 0   ;;  %s2334_s30 = smov 0  }
   0x9   :  { %s2336_s15 = smov 0   ;;  %s2338_s16 = smov 0  }
   0xa LB: > { %2793 = sst [smem:[#allocation19_spill]] %s2223_s29  ;;  %s2353_s17 = sadd.s32 4294967295, %s2235_s16   ;;  %s2235_s16 = sphi %s2338_s16, %s2822_s16   ;;  %s2231_s15 = sphi %s2336_s15, %s2824_s15   ;;  %s2227_s30 = sphi %s2334_s30, %s2826_s30   ;;  %s2223_s29 = sphi %s2332_s29, %s2825_s29  }
   0xb   : > { %2794 = sst [smem:[#allocation20_spill]] %s2231_s15  ;;  %s1655_s18 = sadd.s32 4294967294, %s2235_s16  }
   0xc   : > { %2795 = sst [smem:[#allocation21_spill]] %s2235_s16  ;;  %s2357_s19 = sadd.s32 1, %s2235_s16  }
   0xd   : > { %2796 = sst [smem:[#allocation22_spill]] %s2357_s19  ;;  %s342_s20 = sadd.s32 1, %s2231_s15 }
   0xe   : > { %s339_s21 = ssub.s32 %s2235_s16, %s2357_s19  ;;  %p352_p0 = scmp.ne.s32.totalorder %s2231_s15, %s2227_s30 }
   0xf   : > { %p340_p1 = scmp.eq.s32.totalorder %s339_s21, 0  ;;  %p353_p2 = scmp.eq.s32.totalorder %s2353_s17, 1 }
  0x10   : > { %p358_p3 = scmp.ne.s32.totalorder %s2227_s30, %s2223_s29  ;;  %p359_p4 = scmp.eq.s32.totalorder %s1655_s18, 1 }
  0x11   : > { %s2368_s22 = scalar_select %p340_p1, %s2231_s15, %s342_s20  }
  0x12   : > { %p2370_p5 = por %p353_p2, %p352_p0  ;;  %p2374_p6 = por %p359_p4, %p358_p3 }
  0x13   : > { %2797 = sst [smem:[#allocation23_spill]] %s2368_s22  ;;  %p1656_p7 = scmp.ge.s32.totalorder %s2235_s16, 1 }
  0x14   : > { %s2798_s23 = scalar_select %p2370_p5, 1, 0 }
  0x15   : > { %s2800_s24 = scalar_select %p2374_p6, 1, 0 }
  0x16   : > { %2799 = sst [smem:[#allocation24_spill]] %s2798_s23  ;;  %p366_p8 = scmp.lt.s32.totalorder %s2235_s16, 3 }
  0x17   : > { %2801 = sst [smem:[#allocation25_spill]] %s2800_s24  ;;  %p2785_p9 = scmp.eq.s32.totalorder %s2353_s17, 0 }
  0x18   : > { %p2381_p10 = pnand %p1656_p7, %p366_p8  ;;  %s2237_s26 = smov [#allocation5]  }
  0x19   : > { %s390_s27 = sshll.u32 %s2237_s26, 4  ;;  %s2238_s28 = smov [#allocation8]   ;;  %s391_s27 = int_to_ptr.vmem [resolvable:$true] %s390_s27 }
  0x1a   : > { %s2802_s25 = scalar_select %p2381_p10, 1, 0 }
  0x1b   : > { %p1870_p11 = pneg %p2381_p10  ;;  %s418_s18 = sshll.u32 %s2238_s28, 4  ;;  %s2393_s18 = int_to_ptr.vmem [resolvable:$true] %s418_s18 }
  0x1c   : > { %s2239_s21 = smov [#allocation2]   ;;  %s2804_s3 = sld [smem:[#allocation26_spill]] }
  0x1d   : > { %p2389_p12 = pnand %p2785_p9, %p1870_p11  ;;  %s379_s22 = sshll.u32 %s2239_s21, 4  ;;  %s2395_s22 = int_to_ptr.vmem [resolvable:$true] %s379_s22 }
  0x1f   : > { %p2405_p0 = pneg %p2389_p12 }
  0x22   : > { %s1989_s26 = scalar_lea.hbm %s2804_s3, 16 }
  0x23   : > { %p1990_p13 = scmp.ne.s32.totalorder %s2804_s3, %s1989_s26  ;;  %p1996_p3 = scmp.lt.u32.totalorder %s1989_s26, %s2804_s3 }
  0x25   : > { %p1992_p1 = pnand %p2405_p0, %p1990_p13 }
  0x27   : > { %p1993_p2 = pneg %p1992_p1 }
  0x29   : > { %p1998_p4 = pnand %p1996_p3, %p1993_p2 }
  0x2b   : > { %2001 = shalt.err (!%p1998_p4)
}
  0x2c   : > { %s2002_s15 = scalar_lea.vmem %s391_s27, 16  ;;  %s2009_s29 = scalar_lea.vmem %s391_s27, 32 }
  0x2d   : > { %p2003_p7 = scmp.ne.s32.totalorder %s391_s27, %s2002_s15  ;;  %p2010_p9 = scmp.lt.s32.totalorder %s391_s27, %s391_s27 }
  0x2e   : > { %p2011_p6 = scmp.lt.s32.totalorder %s2009_s29, %s2002_s15 }
  0x2f   : > { %p2005_p8 = pnand %p2003_p7, %p2405_p0 }
  0x30   : > { %p2012_p5 = por %p2011_p6, %p2010_p9 }
  0x31   : > { %p2006_p11 = pneg %p2005_p8 }
  0x33   : > { %p2013_p10 = pnand %p2012_p5, %p2006_p11 }
  0x35   : > { %2016 = shalt.err (!%p2013_p10)
}
  0x36   : > { %1876 = dma.hbm_to_vmem [thread:$0]  (!%p2389_p12), %s2804_s3, 16, %s391_s27, [#allocation6]  }
  0x37   : > { %s2017_s21 = scalar_lea.hbm %s2771_s7, 16 }
  0x38   : > { %p2018_p13 = scmp.ne.s32.totalorder %s2771_s7, %s2017_s21  ;;  %p2024_p5 = scmp.lt.u32.totalorder %s2017_s21, %s2771_s7 }
  0x3a   : > { %p2020_p1 = pnand %p2018_p13, %p2405_p0 }
  0x3c   : > { %p2021_p6 = pneg %p2020_p1 }
  0x3e   : > { %p2026_p9 = pnand %p2024_p5, %p2021_p6 }
  0x40   : > { %2029 = shalt.err (!%p2026_p9)
}
  0x41   : > { %s2030_s27 = scalar_lea.vmem %s2393_s18, 16  ;;  %s2037_s14 = scalar_lea.vmem %s2393_s18, 32 }
  0x42   : > { %p2031_p10 = scmp.ne.s32.totalorder %s2393_s18, %s2030_s27  ;;  %p2038_p4 = scmp.lt.s32.totalorder %s2393_s18, %s2393_s18 }
  0x43   : > { %p2039_p7 = scmp.lt.s32.totalorder %s2037_s14, %s2030_s27 }
  0x44   : > { %p2033_p2 = pnand %p2031_p10, %p2405_p0 }
  0x45   : > { %p2040_p8 = por %p2039_p7, %p2038_p4 }
  0x46   : > { %p2034_p3 = pneg %p2033_p2 }
  0x48   : > { %p2041_p11 = pnand %p2040_p8, %p2034_p3 }
  0x4a   : > { %2044 = shalt.err (!%p2041_p11)
}
  0x4b   : > { %1882 = dma.hbm_to_vmem [thread:$0]  (!%p2389_p12), %s2771_s7, 16, %s2393_s18, [#allocation9]  }
  0x4c   : > { %s2045_s26 = scalar_lea.hbm %s2766_s2, 16 }
  0x4d   : > { %p2046_p13 = scmp.ne.s32.totalorder %s2766_s2, %s2045_s26  ;;  %p2052_p5 = scmp.lt.u32.totalorder %s2045_s26, %s2766_s2 }
  0x4f   : > { %p2048_p1 = pnand %p2046_p13, %p2405_p0 }
  0x51   : > { %p2049_p6 = pneg %p2048_p1 }
  0x53   : > { %p2054_p9 = pnand %p2052_p5, %p2049_p6 }
  0x55   : > { %2057 = shalt.err (!%p2054_p9)
}
  0x56   : > { %s2058_s18 = scalar_lea.vmem %s2395_s22, 16  ;;  %s2065_s14 = scalar_lea.vmem %s2395_s22, 32 }
  0x57   : > { %p2059_p10 = scmp.ne.s32.totalorder %s2395_s22, %s2058_s18  ;;  %p2066_p4 = scmp.lt.s32.totalorder %s2395_s22, %s2395_s22 }
  0x58   : > { %p2067_p7 = scmp.lt.s32.totalorder %s2065_s14, %s2058_s18 }
  0x59   : > { %p2061_p2 = pnand %p2059_p10, %p2405_p0 }
  0x5a   : > { %p2068_p8 = por %p2067_p7, %p2066_p4 }
  0x5b   : > { %p2062_p3 = pneg %p2061_p2 }
  0x5d   : > { %p2069_p11 = pnand %p2068_p8, %p2062_p3 }
  0x5f   : > { %2072 = shalt.err (!%p2069_p11)
}
  0x60   : > { %1873 = dma.hbm_to_vmem [thread:$0]  (!%p2389_p12), %s2766_s2, 16, %s2395_s22, [#allocation3]  }
  0x61   : > { %s2240_s24 = smov [#allocation7]   ;;  %s2241_s26 = smov [#allocation10]  }
  0x62   : > { %s404_s16 = sshll.u32 %s2240_s24, 4  ;;  %s429_s21 = sshll.u32 %s2241_s26, 4  ;;  %s405_s16 = int_to_ptr.vmem [resolvable:$true] %s404_s16  ;;  %s430_s21 = int_to_ptr.vmem [resolvable:$true] %s429_s21 }
  0x63   : > { %s2073_s27 = scalar_lea.hbm %s2769_s5, 16 }
  0x64   : > { %p2074_p13 = scmp.ne.s32.totalorder %s2769_s5, %s2073_s27  ;;  %p2080_p5 = scmp.lt.u32.totalorder %s2073_s27, %s2769_s5 }
  0x66   : > { %p2076_p1 = pnand %p2074_p13, %p2405_p0 }
  0x68   : > { %p2077_p6 = pneg %p2076_p1 }
  0x6a   : > { %p2082_p9 = pnand %p2080_p5, %p2077_p6 }
  0x6c   : > { %2085 = shalt.err (!%p2082_p9)
}
  0x6d   : > { %s2086_s22 = scalar_lea.vmem %s405_s16, 16  ;;  %s2093_s19 = scalar_lea.vmem %s405_s16, 32 }
  0x6e   : > { %p2087_p10 = scmp.ne.s32.totalorder %s405_s16, %s2086_s22  ;;  %p2094_p4 = scmp.lt.s32.totalorder %s405_s16, %s405_s16 }
  0x6f   : > { %p2095_p7 = scmp.lt.s32.totalorder %s2093_s19, %s2086_s22 }
  0x70   : > { %p2089_p2 = pnand %p2087_p10, %p2405_p0 }
  0x71   : > { %p2096_p8 = por %p2095_p7, %p2094_p4 }
  0x72   : > { %p2090_p3 = pneg %p2089_p2 }
  0x74   : > { %p2097_p11 = pnand %p2096_p8, %p2090_p3 }
  0x76   : > { %2100 = shalt.err (!%p2097_p11)
}
  0x77   : > { %1879 = dma.hbm_to_vmem [thread:$0]  (!%p2389_p12), %s2769_s5, 16, %s405_s16, [#allocation6]  }
  0x78   : > { %s2101_s29 = scalar_lea.hbm %s2772_s8, 16 }
  0x79   : > { %p2102_p13 = scmp.ne.s32.totalorder %s2772_s8, %s2101_s29  ;;  %p2108_p5 = scmp.lt.u32.totalorder %s2101_s29, %s2772_s8 }
  0x7b   : > { %p2104_p1 = pnand %p2102_p13, %p2405_p0 }
  0x7d   : > { %p2105_p6 = pneg %p2104_p1 }
  0x7f   : > { %p2110_p9 = pnand %p2108_p5, %p2105_p6 }
  0x81   : > { %2113 = shalt.err (!%p2110_p9)
}
  0x82   : > { %s2114_s22 = scalar_lea.vmem %s430_s21, 16  ;;  %s2121_s16 = scalar_lea.vmem %s430_s21, 32 }
  0x83   : > { %p2115_p10 = scmp.ne.s32.totalorder %s430_s21, %s2114_s22  ;;  %p2122_p4 = scmp.lt.s32.totalorder %s430_s21, %s430_s21 }
  0x84   : > { %p2123_p7 = scmp.lt.s32.totalorder %s2121_s16, %s2114_s22 }
  0x85   : > { %p2117_p2 = pnand %p2115_p10, %p2405_p0 }
  0x86   : > { %p2124_p8 = por %p2123_p7, %p2122_p4 }
  0x87   : > { %p2118_p3 = pneg %p2117_p2 }
  0x89   : > { %p2125_p11 = pnand %p2124_p8, %p2118_p3 }
  0x8b   : > { %2128 = shalt.err (!%p2125_p11)
}
  0x8c   : > { %1885 = dma.hbm_to_vmem [thread:$0]  (!%p2389_p12), %s2772_s8, 16, %s430_s21, [#allocation9]  }
  0x8d   : > { %s2242_s26 = smov [#allocation11]   ;;  %s2129_s27 = scalar_lea.hbm %s2773_s9, 16 }
  0x8e   : > { %s440_s3 = sshll.u32 %s2242_s26, 4  ;;  %p2130_p13 = scmp.ne.s32.totalorder %s2773_s9, %s2129_s27  ;;  %s441_s3 = int_to_ptr.vmem [resolvable:$true] %s440_s3 }
  0x8f   : > { %p2136_p5 = scmp.lt.u32.totalorder %s2129_s27, %s2773_s9 }
  0x90   : > { %p2132_p1 = pnand %p2130_p13, %p2405_p0 }
  0x92   : > { %p2133_p6 = pneg %p2132_p1 }
  0x94   : > { %p2138_p9 = pnand %p2136_p5, %p2133_p6 }
  0x96   : > { %2141 = shalt.err (!%p2138_p9)
}
  0x97   : > { %s2142_s21 = scalar_lea.vmem %s441_s3, 16  ;;  %s2149_s16 = scalar_lea.vmem %s441_s3, 32 }
  0x98   : > { %p2143_p10 = scmp.ne.s32.totalorder %s441_s3, %s2142_s21  ;;  %p2150_p4 = scmp.lt.s32.totalorder %s441_s3, %s441_s3 }
  0x99   : > { %p2151_p7 = scmp.lt.s32.totalorder %s2149_s16, %s2142_s21 }
  0x9a   : > { %p2145_p2 = pnand %p2143_p10, %p2405_p0 }
  0x9b   : > { %p2152_p8 = por %p2151_p7, %p2150_p4 }
  0x9c   : > { %p2146_p3 = pneg %p2145_p2 }
  0x9e   : > { %p2153_p11 = pnand %p2152_p8, %p2146_p3 }
  0xa0   : > { %2156 = shalt.err (!%p2153_p11)
}
  0xa1   : > { %1888 = dma.hbm_to_vmem [thread:$0]  (!%p2389_p12), %s2773_s9, 16, %s441_s3, [#allocation12]  }
  0xa2   : > { %p2806_p13 = scmp.ne.s32.totalorder %s2802_s25, 0 }
  0xa3   : > { %p2807_p1 = scmp.eq.s32.totalorder (!%p2806_p13), %s2353_s17, 0 }
  0xa4   : > { %478 = sbr.rel (%p2806_p13) target bundleno = 3899 (0xf3b), region = 76 }
  0xab   : > { %2202 = dma.done.wait (%p2807_p1), [#allocation3], 16   ;;  %p2808_p0 = pmov %p2807_p1 }
  0xad   : > { %2204 = vsyncadd (%p2808_p0), [#allocation3], 4294967280  ;;  %p2809_p6 = pmov %p2808_p0 }
  0xae   : > { %p2810_p5 = pmov %p2808_p0 }
  0xaf   : > { %2206 = dma.done.wait (%p2809_p6), [#allocation6], 32  }
  0xb0   : > { %2208 = vsyncadd (%p2810_p5), [#allocation6], 4294967264  ;;  %p2811_p9 = pmov %p2808_p0 }
  0xb1   : > { %p2812_p12 = pmov %p2808_p0 }
  0xb2   : > { %2210 = dma.done.wait (%p2811_p9), [#allocation9], 32  }
  0xb3   : > { %2212 = vsyncadd (%p2812_p12), [#allocation9], 4294967264  ;;  %p2813_p10 = pmov %p2808_p0 }
  0xb4   : > { %p2814_p2 = pmov %p2808_p0 }
  0xb5   : > { %2214 = dma.done.wait (%p2813_p10), [#allocation12], 16  }
  0xb6   : > { %2216 = vsyncadd (%p2814_p2), [#allocation12], 4294967280  ;;  %p546_p3 = scmp.lt.s32.totalorder %s2353_s17, 1  ;;  %vm560_vm0 = vcmask 261120   ;;  %v1957_v7 = vld [vmem:[%s2768_s4] sm:$0xff]   ;;  %v2243_v8 = vmov 0.0   ;;  %v721_v37 = vlaneseq }
  0xb7   : > { %1744 = vmatprep.subr.bf16.mxu1 %v2243_v8  ;;  %vm2244_vm1 = vmmov 0   ;;  %v1958_v9 = vld [vmem:[%s2768_s4 + $0x8] sm:$0xff]   ;;  %1758 = vmatprep.subr.bf16.mxu0 %v2243_v8  ;;  %v1674_v18 = vld [vmem:[#allocation2] ss:$0 sm:$0xff]  ;;  %v1675_v21 = vld [vmem:[#allocation5] ss:$0 sm:$0xff] }
  0xb8   : > { %s2543_s25 = scalar_select %p546_p3, %s2353_s17, 1  ;;  %1748 = vmatprep.mubr.msk.bf16.mxu1 %vm2244_vm1, %v2243_v8  ;;  %1745 = vmatpush3.bf16.msra.mxu1 %v1957_v7  ;;  %v1676_v25 = vld [vmem:[#allocation7] ss:$0 sm:$0xff]  ;;  %vm672_vm4 = vcmask 64512   ;;  %v722_v40 = vshrl.u32 %v721_v37, 7  ;;  %vm744_vm5 = vcmask 1043456  }
  0xb9   : > { %1746 = vmatprep.subr.bf16.mxu1 %v2243_v8  ;;  %1760 = vmatprep.mubr.msk.bf16.mxu0 %vm2244_vm1, %v2243_v8  ;;  %s2245_s14 = smov 120   ;;  %s2246_s23 = smov 96   ;;  %vm1467_vm8 = vcmask 523264  }
  0xba   : > { %s1672_s20 = sshll.u32 %s2543_s25, 3  ;;  %s2247_s22 = smov 88   ;;  %v723_v42 = vsub.s32 0, %v722_v40 }
  0xbb   : > { %s549_s3 = scalar_lea.vmem %s2764_s0, %s1672_s20  ;;  %s552_s19 = scalar_lea.vmem %s2765_s1, %s2543_s25 }
  0xbc   : > { %v2549_v0 = vld [vmem:[%s549_s3] sm:$0xff]  ;;  %1747 = vmatpush3.bf16.msra.mxu1 %v1958_v9  ;;  %s2248_s24 = smov 56   ;;  %s2249_s25 = smov 64  }
  0xbd   : > { %v561_v1 = vsel %vm560_vm0, %v2549_v0, 0.0  ;;  %1752 = vmatprep.subr.bf16.mxu1 %v2243_v8  ;;  %v555_v38 = vld [vmem:[%s552_s19] sm:$0x1]  ;;  %s2250_s20 = smov 80   ;;  %s2251_s28 = smov 112  }
  0xbe   : > { %562 = vadd.xlane.f32.xlu0 %v561_v1  ;;  %v1673_v39 = vadd.f32 -1.0, %v555_v38  ;;  %s2252_s27 = smov 48   ;;  %s2253_s18 = smov 104  }
  0xbf   : > { %s2255_s21 = smov 40   ;;  %s543_s16 = sand.u32 1, %s2227_s30  }
  0xc0   : > { %v557_v41 = vmul.f32 1e+09, %v1673_v39  ;;  %s1671_s19 = sshll.u32 %s543_s16, 3 }
  0xc1   : > { %s545_s26 = scalar_lea.vmem [#allocation13], %s1671_s19 }
  0xc2   : > { %v2592_v43 = vrot.slane %v557_v41, %v723_v42  ;;  %s1527_s3 = sshll.u32 %s545_s26, 4  ;;  %s2723_s3 = int_to_ptr.vmem [resolvable:$true] %s1527_s3 }
 0x14b   : > { %v563_v2 = vpop.xlane.xlu0 %562 }
 0x14c   : > { %v565_v3 = vmul.f32 0.03125, %v563_v2 }
 0x14e   : > { %v566_v4 = vsub.f32 %v2549_v0, %v565_v3 }
 0x150   : > { %v567_v5 = vmul.f32 %v566_v4, %v566_v4  ;;  %v586_v19 = vmul.f32 %v1674_v18, %v566_v4  ;;  %v664_v18 = vld [vmem:[%s2770_s6] sm:$0xf] }
 0x152   : > { %v568_v6 = vsel %vm560_vm0, %v567_v5, 0.0 }
 0x153   : > { %569 = vadd.xlane.f32.xlu0 %v568_v6 }
 0x1e0   : > { %v570_v10 = vpop.xlane.xlu0 %569 }
 0x1e1   : > { %v572_v11 = vmul.f32 0.032258064, %v570_v10 }
 0x1e3   : > { %1965 = vrsqrt.f32 %v572_v11  ;;  %vm575_vm2 = vcmp.eq.f32.partialorder %v572_v11, inf  ;;  %v578_v14 = vand.u32 2147483648, %v572_v11  ;;  %vm577_vm3 = vcmp.eq.f32.partialorder %v572_v11, 0.0 }
 0x1ed   : > { %v1966_v12 = vpop.eup %1965 }
 0x1ee   : > { %v574_v13 = vmul.f32 %v1966_v12, %v572_v11 }
 0x1f0   : > { %v576_v15 = vsel %vm575_vm2, %v572_v11, %v574_v13 }
 0x1f1   : > { %v579_v16 = vsel %vm577_vm3, %v578_v14, %v576_v15 }
 0x1f2   : > { %v587_v17 = vadd.f32 1e-06, %v579_v16 }
 0x1f4   : > { %1967 = vrcp.f32 %v587_v17 }
 0x1fe   : > { %v1968_v20 = vpop.eup %1967 }
 0x1ff   : > { %v589_v22 = vmul.f32 %v1968_v20, %v586_v19  ;;  %v952_v19 = vsel %vm744_vm5, %v664_v18, 0  ;;  %v665_v20 = vld [vmem:[%s2770_s6 + $0x4] sm:$0xf] }
 0x201   : > { %v596_v23 = vadd.f32 %v1675_v21, %v589_v22  ;;  %v906_v21 = vsel %vm744_vm5, %v665_v20, 0 }
 0x203   : > { %v597_v24 = vpack.c.bf16 %v596_v23, %v596_v23 }
 0x205   : > { %1749 = vmatmul.mubr.msk.bf16.vlgmr.msra.gmra.mrb[0].mxu1 %vm560_vm0, %v597_v24 }
 0x206   : > { %1754 = vmatprep.mubr.msk.bf16.mxu1 %vm2244_vm1, %v2243_v8 }
 0x2d8   : > { %v658_v26 = vpop.f32.mrb[0].mxu1 }
 0x2d9   : > { %v659_v27 = vadd.f32 %v1676_v25, %v658_v26  ;;  %v1750_v28 = vpop.f32.mrb[1].mxu1 }
 0x2da   : > { %v661_v29 = vpop.f32.mrb[2].mxu1 }
 0x2db   : > { %v2572_v30 = vpack.c.bf16 %v659_v27, %v659_v27  ;;  %v1751_v31 = vpop.f32.mrb[3].mxu1 }
 0x2dd   : > { %789 = vrot.lane.b32.xlu0 %v2572_v30, %s2245_s14  ;;  %670 = vrot.lane.b32.xlu1 %v2572_v30, %s2246_s23  ;;  %s2254_s14 = smov 72   ;;  %s2256_s23 = smov [#allocation13]  }
 0x2e1   : > { %791 = vrot.lane.b32.xlu1 %v2572_v30, %s2247_s22  ;;  %s2161_s22 = sshll.u32 %s2256_s23, 4  ;;  %s2162_s22 = int_to_ptr.vmem [resolvable:$false] %s2161_s22 }
 0x2e2   : > { %p2164_p13 = scmp.lt.s32.totalorder %s2723_s3, %s2162_s22 }
 0x34f   : > { %v671_v32 = vpop.permute.xlu1 %670  ;;  %v790_v36 = vpop.permute.xlu0 %789 }
 0x350   : > { %v677_v33 = vsel %vm672_vm4, %v671_v32, 0 }
 0x351   : > { %1753 = vmatpush3.bf16.xpose.msra.mxu1 %v677_v33 }
 0x352   : > { %1764 = vmatprep.subr.bf16.mxu1 %v2243_v8 }
 0x353   : > { %v792_v34 = vpop.permute.xlu1 %791 }
 0x354   : > { %v797_v35 = vsel %vm672_vm4, %v792_v34, 0 }
 0x358   : > { %1755 = vmatmul.mubr.msk.bf16.vlgmr.msra.gmra.mrb[4].mxu1 %vm672_vm4, %v2572_v30 }
 0x359   : > { %1765 = vmatpush3.bf16.xpose.msra.mxu1 %v797_v35  ;;  %1766 = vmatprep.mubr.msk.bf16.mxu1 %vm2244_vm1, %v2243_v8 }
 0x35a   : > { %1776 = vmatprep.subr.bf16.mxu1 %v2243_v8 }
 0x360   : > { %1767 = vmatmul.mubr.msk.bf16.vlgmr.msra.gmra.mrb[8].mxu1 %vm672_vm4, %v790_v36 }
 0x361   : > { %1778 = vmatprep.mubr.msk.bf16.mxu1 %vm2244_vm1, %v2243_v8  ;;  %1777 = vmatpush3.bf16.msra.mxu1 %v906_v21 }
 0x362   : > { %1788 = vmatprep.subr.bf16.mxu1 %v2243_v8 }
 0x42b   : > { %v713_v44 = vpop.f32.mrb[4].mxu1 }
 0x42c   : > { %v719_v45 = vmul.f32 0.35355338, %v713_v44  ;;  %v1756_v46 = vpop.f32.mrb[5].mxu1 }
 0x42d   : > { %v716_v47 = vpop.f32.mrb[6].mxu1 }
 0x42e   : > { %v1757_v48 = vpop.f32.mrb[7].mxu1  ;;  %v726_v49 = vadd.f32 %v2592_v43, %v719_v45 }
 0x430   : > { %v727_v50 = vsel %vm672_vm4, %v726_v49, -inf }
 0x431   : > { %728 = vmax.xlane.f32.xlu1 %v727_v50 }
 0x433   : > { %v833_v51 = vpop.f32.mrb[8].mxu1 }
 0x434   : > { %v839_v52 = vmul.f32 0.35355338, %v833_v51  ;;  %v1768_v53 = vpop.f32.mrb[9].mxu1 }
 0x435   : > { %v836_v54 = vpop.f32.mrb[10].mxu1 }
 0x436   : > { %v1769_v55 = vpop.f32.mrb[11].mxu1  ;;  %v840_v56 = vadd.f32 %v839_v52, %v2592_v43 }
 0x438   : > { %v841_v57 = vsel %vm672_vm4, %v840_v56, -inf }
 0x439   : > { %842 = vmax.xlane.f32.xlu0 %v841_v57 }
 0x44f   : > { %853 = vrot.lane.b32.xlu0 %v2572_v30, %s2248_s24 }
 0x4be   : > { %v729_v58 = vpop.xlane.xlu1 %728 }
 0x4bf   : > { %v730_v59 = vsub.f32 %v726_v49, %v729_v58 }
 0x4c1   : > { %v731_v60 = vmul.f32 1.442695, %v730_v59 }
 0x4c3   : > { %1969 = vpow2.f32 %v731_v60 }
 0x4c6   : > { %v843_v61 = vpop.xlane.xlu0 %842 }
 0x4c7   : > { %v844_v62 = vsub.f32 %v840_v56, %v843_v61 }
 0x4c9   : > { %v845_v63 = vmul.f32 1.442695, %v844_v62 }
 0x4ca   : > { %v854_v12 = vpop.permute.xlu0 %853 }
 0x4cb   : > { %1971 = vpow2.f32 %v845_v63  ;;  %v859_v14 = vsel %vm744_vm5, %v854_v12, 0 }
 0x4cd   : > { %v1970_v1 = vpop.eup %1969 }
 0x4ce   : > { %v733_v2 = vsel %vm672_vm4, %v1970_v1, 0.0 }
 0x4cf   : > { %734 = vadd.xlane.f32.xlu1 %v733_v2 }
 0x4d5   : > { %v1972_v3 = vpop.eup %1971 }
 0x4d6   : > { %v847_v4 = vsel %vm672_vm4, %v1972_v3, 0.0 }
 0x4d7   : > { %848 = vadd.xlane.f32.xlu1 %v847_v4  ;;  %v666_v4 = vld [vmem:[%s2770_s6 + $0x8] sm:$0xf] }
 0x4e8   : > { %739 = vrot.lane.b32.xlu1 %v2572_v30, %s2249_s25 }
 0x4ec   : > { %996 = vrot.lane.b32.xlu1 %v2572_v30, %s2250_s20  ;;  %s2815_s20 = sld [smem:[#allocation24_spill]] }
 0x4f0   : > { %994 = vrot.lane.b32.xlu1 %v2572_v30, %s2251_s28  ;;  %s1706_s28 = sshll.u32 %s2353_s17, 7  ;;  %s1514_s17 = scalar_lea.sflag [#allocation4], %s543_s16 }
 0x4f2   : > { %p2817_p7 = scmp.ne.s32.totalorder %s2815_s20, 0 }
 0x55c   : > { %v735_v5 = vpop.xlane.xlu1 %734 }
 0x55d   : > { %1973 = vrcp.f32 %v735_v5  ;;  %v1111_v5 = vsel %vm744_vm5, %v666_v4, 0  ;;  %v1693_v4 = vld [vmem:[#allocation10] ss:$0 sm:$0xff] }
 0x564   : > { %v849_v6 = vpop.xlane.xlu1 %848 }
 0x565   : > { %1975 = vrcp.f32 %v849_v6 }
 0x567   : > { %v1974_v7 = vpop.eup %1973 }
 0x568   : > { %v740_v9 = vpop.permute.xlu1 %739  ;;  %v737_v10 = vmul.f32 %v1974_v7, %v1970_v1 }
 0x569   : > { %v746_v11 = vsel %vm744_vm5, %v740_v9, 0 }
 0x56a   : > { %1759 = vmatpush3.bf16.msra.mxu0 %v746_v11  ;;  %v738_v13 = vpack.c.bf16 %v737_v10, %v737_v10 }
 0x56b   : > { %1770 = vmatprep.subr.bf16.mxu0 %v2243_v8 }
 0x56c   : > { %v997_v27 = vpop.permute.xlu1 %996 }
 0x56d   : > { %1761 = vmatmul.mubr.msk.bf16.vlgmr.msra.gmra.mrb[0].mxu0 %vm672_vm4, %v738_v13  ;;  %v1002_v33 = vsel %vm672_vm4, %v997_v27, 0 }
 0x56e   : > { %1771 = vmatpush3.bf16.msra.mxu0 %v859_v14  ;;  %1772 = vmatprep.mubr.msk.bf16.mxu0 %vm2244_vm1, %v2243_v8 }
 0x56f   : > { %v1976_v15 = vpop.eup %1975  ;;  %1782 = vmatprep.subr.bf16.mxu0 %v2243_v8 }
 0x570   : > { %v851_v16 = vmul.f32 %v1976_v15, %v1972_v3  ;;  %v995_v35 = vpop.permute.xlu1 %994 }
 0x572   : > { %v852_v17 = vpack.c.bf16 %v851_v16, %v851_v16 }
 0x575   : > { %1773 = vmatmul.mubr.msk.bf16.vlgmr.msra.gmra.mrb[4].mxu0 %vm672_vm4, %v852_v17 }
 0x576   : > { %1784 = vmatprep.mubr.msk.bf16.mxu0 %vm2244_vm1, %v2243_v8  ;;  %1783 = vmatpush3.bf16.msra.mxu0 %v952_v19 }
 0x577   : > { %1794 = vmatprep.subr.bf16.mxu0 %v2243_v8 }
 0x640   : > { %v782_v22 = vpop.f32.mrb[0].mxu0 }
 0x641   : > { %v788_v23 = vpack.c.bf16 %v782_v22, %v782_v22  ;;  %v1762_v24 = vpop.f32.mrb[1].mxu0 }
 0x642   : > { %v785_v25 = vpop.f32.mrb[2].mxu0  ;;  %v667_v24 = vld [vmem:[%s2770_s6 + $0xc] sm:$0xf] }
 0x643   : > { %v1763_v26 = vpop.f32.mrb[3].mxu0  ;;  %1785 = vmatmul.mubr.msk.bf16.vlgmr.msra.gmra.mrb[8].mxu0 %vm672_vm4, %v788_v23 }
 0x644   : > { %1796 = vmatprep.mubr.msk.bf16.mxu0 %vm2244_vm1, %v2243_v8 }
 0x648   : > { %v895_v28 = vpop.f32.mrb[4].mxu0 }
 0x649   : > { %v901_v29 = vpack.c.bf16 %v895_v28, %v895_v28  ;;  %v1774_v31 = vpop.f32.mrb[5].mxu0 }
 0x64a   : > { %v898_v32 = vpop.f32.mrb[6].mxu0 }
 0x64b   : > { %v1775_v34 = vpop.f32.mrb[7].mxu0  ;;  %1779 = vmatmul.mubr.msk.bf16.vlgmr.msra.gmra.mrb[12].mxu1 %vm672_vm4, %v901_v29 }
 0x64c   : > { %1789 = vmatpush3.bf16.xpose.msra.mxu1 %v1002_v33  ;;  %1790 = vmatprep.mubr.msk.bf16.mxu1 %vm2244_vm1, %v2243_v8 }
 0x64d   : > { %1800 = vmatprep.subr.bf16.mxu1 %v2243_v8 }
 0x653   : > { %1791 = vmatmul.mubr.msk.bf16.vlgmr.msra.gmra.mrb[16].mxu1 %vm672_vm4, %v995_v35 }
 0x654   : > { %1802 = vmatprep.mubr.msk.bf16.mxu1 %vm2244_vm1, %v2243_v8  ;;  %1801 = vmatpush3.bf16.msra.mxu1 %v1111_v5 }
 0x655   : > { %1812 = vmatprep.subr.bf16.mxu1 %v2243_v8 }
 0x716   : > { %v988_v36 = vpop.f32.mrb[8].mxu0 }
 0x717   : > { %v1786_v37 = vpop.f32.mrb[9].mxu0 }
 0x718   : > { %v991_v38 = vpop.f32.mrb[10].mxu0 }
 0x719   : > { %v1787_v39 = vpop.f32.mrb[11].mxu0 }
 0x71e   : > { %v942_v40 = vpop.f32.mrb[12].mxu1 }
 0x71f   : > { %v2635_v41 = vadd.f32 %v988_v36, %v942_v40  ;;  %v1780_v42 = vpop.f32.mrb[13].mxu1 }
 0x720   : > { %v945_v44 = vpop.f32.mrb[14].mxu1 }
 0x721   : > { %v1781_v45 = vpop.f32.mrb[15].mxu1 }
 0x722   : > { %v1692_v45 = vld [vmem:[#allocation8] ss:$0 sm:$0xff] }
 0x726   : > { %v1038_v46 = vpop.f32.mrb[16].mxu1 }
 0x727   : > { %v1044_v47 = vmul.f32 0.35355338, %v1038_v46  ;;  %v1792_v48 = vpop.f32.mrb[17].mxu1 }
 0x728   : > { %v1041_v49 = vpop.f32.mrb[18].mxu1 }
 0x729   : > { %v1793_v50 = vpop.f32.mrb[19].mxu1  ;;  %v1045_v51 = vadd.f32 %v1044_v47, %v2592_v43 }
 0x72b   : > { %v1046_v52 = vsel %vm672_vm4, %v1045_v51, -inf }
 0x72c   : > { %1047 = vmax.xlane.f32.xlu1 %v1046_v52 }
 0x73d   : > { %1058 = vrot.lane.b32.xlu1 %v2572_v30, %s2252_s27  ;;  %s2816_s27 = sld [smem:[#allocation27_spill]] }
 0x741   : > { %1154 = vrot.lane.b32.xlu1 %v2572_v30, %s2253_s18 }
 0x743   : > { %s2721_s18 = scalar_lea.hbm %s2816_s27, %s1706_s28 }
 0x7b9   : > { %v1048_v53 = vpop.xlane.xlu1 %1047 }
 0x7ba   : > { %v1049_v54 = vsub.f32 %v1045_v51, %v1048_v53 }
 0x7bc   : > { %v1050_v55 = vmul.f32 1.442695, %v1049_v54 }
 0x7bd   : > { %v1059_v56 = vpop.permute.xlu1 %1058 }
 0x7be   : > { %1977 = vpow2.f32 %v1050_v55  ;;  %v1064_v57 = vsel %vm744_vm5, %v1059_v56, 0  ;;  %v1959_v56 = vld [vmem:[%s2774_s10] sm:$0xff]  }
 0x7bf   : > { %1795 = vmatpush3.bf16.msra.mxu0 %v1064_v57  ;;  %v1961_v57 = vld [vmem:[%s2776_s12] sm:$0xff]  }
 0x7c0   : > { %1806 = vmatprep.subr.bf16.mxu0 %v2243_v8 }
 0x7c1   : > { %v1155_v3 = vpop.permute.xlu1 %1154 }
 0x7c8   : > { %v1978_v58 = vpop.eup %1977 }
 0x7c9   : > { %v1052_v59 = vsel %vm672_vm4, %v1978_v58, 0.0 }
 0x7ca   : > { %1053 = vadd.xlane.f32.xlu0 %v1052_v59 }
 0x7e0   : > { %1156 = vrot.lane.b32.xlu0 %v2572_v30, %s2254_s14  ;;  %s2157_s14 = scalar_lea.vmem %s2723_s3, 128 }
 0x7e1   : > { %p2158_p4 = scmp.ne.s32.totalorder %s2723_s3, %s2157_s14 }
 0x7e3   : > { %p2159_p8 = pnand %p2158_p4, %p2817_p7 }
 0x7e5   : > { %p2160_p11 = pneg %p2159_p8 }
 0x857   : > { %v1054_v60 = vpop.xlane.xlu0 %1053 }
 0x858   : > { %1979 = vrcp.f32 %v1054_v60 }
 0x85b   : > { %v1157_v63 = vpop.permute.xlu0 %1156 }
 0x85c   : > { %v1162_v2 = vsel %vm672_vm4, %v1157_v63, 0 }
 0x862   : > { %v1980_v61 = vpop.eup %1979 }
 0x863   : > { %v1056_v62 = vmul.f32 %v1980_v61, %v1978_v58  ;;  %v1962_v58 = vld [vmem:[%s2776_s12 + $0x8] sm:$0xff]  }
 0x865   : > { %v1057_v1 = vpack.c.bf16 %v1056_v62, %v1056_v62 }
 0x867   : > { %1797 = vmatmul.mubr.msk.bf16.vlgmr.msra.gmra.mrb[12].mxu0 %vm672_vm4, %v1057_v1 }
 0x868   : > { %1807 = vmatpush3.bf16.xpose.msra.mxu0 %v1162_v2  ;;  %1808 = vmatprep.mubr.msk.bf16.mxu0 %vm2244_vm1, %v2243_v8 }
 0x869   : > { %1818 = vmatprep.subr.bf16.mxu0 %v2243_v8 }
 0x86f   : > { %1809 = vmatmul.mubr.msk.bf16.vlgmr.msra.gmra.mrb[16].mxu0 %vm672_vm4, %v1155_v3 }
 0x870   : > { %1820 = vmatprep.mubr.msk.bf16.mxu0 %vm2244_vm1, %v2243_v8 }
 0x93a   : > { %v1100_v6 = vpop.f32.mrb[12].mxu0 }
 0x93b   : > { %v1106_v7 = vpack.c.bf16 %v1100_v6, %v1100_v6  ;;  %v1798_v9 = vpop.f32.mrb[13].mxu0 }
 0x93c   : > { %v1103_v10 = vpop.f32.mrb[14].mxu0 }
 0x93d   : > { %v1799_v11 = vpop.f32.mrb[15].mxu0  ;;  %1803 = vmatmul.mubr.msk.bf16.vlgmr.msra.gmra.mrb[20].mxu1 %vm672_vm4, %v1106_v7  ;;  %v1694_v7 = vld [vmem:[#allocation11] ss:$0 sm:$0xff] }
 0x93e   : > { %1814 = vmatprep.mubr.msk.bf16.mxu1 %vm2244_vm1, %v2243_v8 }
 0x942   : > { %v1198_v12 = vpop.f32.mrb[16].mxu0 }
 0x943   : > { %v1204_v13 = vmul.f32 0.35355338, %v1198_v12  ;;  %v1810_v14 = vpop.f32.mrb[17].mxu0  ;;  %v1963_v12 = vld [vmem:[%s2776_s12 + $0x10] sm:$0xff]  }
 0x944   : > { %v1201_v15 = vpop.f32.mrb[18].mxu0  ;;  %v1695_v14 = vld [vmem:[%s2775_s11] ss:$0 sm:$0xff] }
 0x945   : > { %v1811_v16 = vpop.f32.mrb[19].mxu0  ;;  %v1205_v17 = vadd.f32 %v1204_v13, %v2592_v43  ;;  %v1271_v43 = vsel %vm744_vm5, %v667_v24, 0  ;;  %v1964_v13 = vld [vmem:[%s2776_s12 + $0x18] sm:$0xff]  }
 0x946   : > { %1819 = vmatpush3.bf16.msra.mxu0 %v1271_v43 }
 0x947   : > { %v1206_v18 = vsel %vm672_vm4, %v1205_v17, -inf  ;;  %1832 = vmatprep.subr.bf16.mxu0 %v2243_v8 }
 0x948   : > { %1207 = vmax.xlane.f32.xlu1 %v1206_v18 }
 0x9d5   : > { %v1208_v19 = vpop.xlane.xlu1 %1207 }
 0x9d6   : > { %v1209_v20 = vsub.f32 %v1205_v17, %v1208_v19 }
 0x9d8   : > { %v1210_v21 = vmul.f32 1.442695, %v1209_v20 }
 0x9da   : > { %1981 = vpow2.f32 %v1210_v21 }
 0x9e4   : > { %v1982_v22 = vpop.eup %1981 }
 0x9e5   : > { %v1212_v23 = vsel %vm672_vm4, %v1982_v22, 0.0 }
 0x9e6   : > { %1213 = vadd.xlane.f32.xlu0 %v1212_v23 }
 0x9fc   : > { %1218 = vrot.lane.b32.xlu0 %v2572_v30, %s2255_s21  ;;  %s2163_s21 = scalar_lea.vmem %s2162_s22, 256 }
 0x9fd   : > { %p2165_p1 = scmp.lt.s32.totalorder %s2163_s21, %s2157_s14 }
 0x9ff   : > { %p2166_p0 = por %p2165_p1, %p2164_p13 }
 0xa01   : > { %p2167_p6 = pnand %p2166_p0, %p2160_p11 }
 0xa10   : > { %v1147_v25 = vpop.f32.mrb[20].mxu1 }
 0xa11   : > { %v1153_v26 = vadd.f32 %v1147_v25, %v2635_v41  ;;  %v1804_v27 = vpop.f32.mrb[21].mxu1 }
 0xa12   : > { %v1150_v28 = vpop.f32.mrb[22].mxu1 }
 0xa13   : > { %v1805_v29 = vpop.f32.mrb[23].mxu1 }
 0xa73   : > { %v1214_v31 = vpop.xlane.xlu0 %1213 }
 0xa74   : > { %1983 = vrcp.f32 %v1214_v31 }
 0xa77   : > { %v1219_v32 = vpop.permute.xlu0 %1218 }
 0xa78   : > { %v1224_v30 = vsel %vm744_vm5, %v1219_v32, 0 }
 0xa79   : > { %1813 = vmatpush3.bf16.msra.mxu1 %v1224_v30 }
 0xa7a   : > { %1824 = vmatprep.subr.bf16.mxu1 %v2243_v8 }
 0xa7e   : > { %v1984_v33 = vpop.eup %1983 }
 0xa7f   : > { %v1216_v34 = vmul.f32 %v1984_v33, %v1982_v22 }
 0xa81   : > { %v1217_v35 = vpack.c.bf16 %v1216_v34, %v1216_v34 }
 0xa83   : > { %1815 = vmatmul.mubr.msk.bf16.vlgmr.msra.gmra.mrb[24].mxu1 %vm672_vm4, %v1217_v35 }
 0xa84   : > { %1828 = vmatprep.mubr.msk.bf16.mxu1 %vm2244_vm1, %v2243_v8  ;;  %1825 = vmatpush3.bf16.msra.mxu1 %v1959_v56 }
 0xa85   : > { %1826 = vmatprep.subr.bf16.mxu1 %v2243_v8 }
 0xb56   : > { %v1260_v36 = vpop.f32.mrb[24].mxu1 }
 0xb57   : > { %v1266_v37 = vpack.c.bf16 %v1260_v36, %v1260_v36  ;;  %v1816_v38 = vpop.f32.mrb[25].mxu1 }
 0xb58   : > { %v1263_v39 = vpop.f32.mrb[26].mxu1 }
 0xb59   : > { %v1817_v40 = vpop.f32.mrb[27].mxu1  ;;  %1821 = vmatmul.mubr.msk.bf16.vlgmr.msra.gmra.mrb[20].mxu0 %vm672_vm4, %v1266_v37 }
 0xb5a   : > { %1840 = vmatprep.mubr.msk.bf16.mxu0 %vm2244_vm1, %v2243_v8  ;;  %1833 = vmatpush3.bf16.msra.mxu0 %v1961_v57 }
 0xb5b   : > { %1834 = vmatprep.subr.bf16.mxu0 %v2243_v8 }
 0xb5e   : > { %1835 = vmatpush3.bf16.msra.mxu0 %v1962_v58 }
 0xb5f   : > { %1836 = vmatprep.subr.bf16.mxu0 %v2243_v8 }
 0xb62   : > { %1837 = vmatpush3.bf16.msra.mxu0 %v1963_v12 }
 0xb63   : > { %1838 = vmatprep.subr.bf16.mxu0 %v2243_v8  ;;  %v1699_v8 = vld [vmem:[%s2777_s13] ss:$0 sm:$0xff] }
 0xb66   : > { %1839 = vmatpush3.bf16.msra.mxu0 %v1964_v13 }
 0xc2c   : > { %v1307_v41 = vpop.f32.mrb[20].mxu0 }
 0xc2d   : > { %v1313_v42 = vadd.f32 %v1307_v41, %v1153_v26  ;;  %v1822_v44 = vpop.f32.mrb[21].mxu0 }
 0xc2e   : > { %v1310_v46 = vpop.f32.mrb[22].mxu0 }
 0xc2f   : > { %v1314_v47 = vadd.f32 %v1313_v42, %v2549_v0  ;;  %v1823_v48 = vpop.f32.mrb[23].mxu0  ;;  %v1960_v0 = vld [vmem:[%s2774_s10 + $0x8] sm:$0xff]  }
 0xc30   : > { %1827 = vmatpush3.bf16.msra.mxu1 %v1960_v0 }
 0xc31   : > { %v2680_v49 = vadd.f32 %v1692_v45, %v1314_v47 }
 0xc33   : > { %v1325_v50 = vsel %vm560_vm0, %v2680_v49, 0.0 }
 0xc34   : > { %1326 = vadd.xlane.f32.xlu1 %v1325_v50 }
 0xcc1   : > { %v1327_v51 = vpop.xlane.xlu1 %1326 }
 0xcc2   : > { %v1328_v52 = vmul.f32 0.03125, %v1327_v51 }
 0xcc4   : > { %v1329_v53 = vsub.f32 %v2680_v49, %v1328_v52 }
 0xcc6   : > { %v1330_v54 = vmul.f32 %v1329_v53, %v1329_v53  ;;  %v1348_v5 = vmul.f32 %v1693_v4, %v1329_v53 }
 0xcc8   : > { %v1331_v55 = vsel %vm560_vm0, %v1330_v54, 0.0 }
 0xcc9   : > { %1332 = vadd.xlane.f32.xlu1 %v1331_v55 }
 0xd56   : > { %v1333_v59 = vpop.xlane.xlu1 %1332 }
 0xd57   : > { %v1334_v60 = vmul.f32 0.032258064, %v1333_v59 }
 0xd59   : > { %1985 = vrsqrt.f32 %v1334_v60  ;;  %vm1337_vm6 = vcmp.eq.f32.partialorder %v1334_v60, inf  ;;  %v1340_v63 = vand.u32 2147483648, %v1334_v60  ;;  %vm1339_vm7 = vcmp.eq.f32.partialorder %v1334_v60, 0.0 }
 0xd63   : > { %v1986_v61 = vpop.eup %1985 }
 0xd64   : > { %v1336_v62 = vmul.f32 %v1986_v61, %v1334_v60 }
 0xd66   : > { %v1338_v1 = vsel %vm1337_vm6, %v1334_v60, %v1336_v62 }
 0xd67   : > { %v1341_v2 = vsel %vm1339_vm7, %v1340_v63, %v1338_v1 }
 0xd68   : > { %v1349_v3 = vadd.f32 1e-06, %v1341_v2 }
 0xd6a   : > { %1987 = vrcp.f32 %v1349_v3 }
 0xd74   : > { %v1988_v6 = vpop.eup %1987 }
 0xd75   : > { %v1351_v9 = vmul.f32 %v1988_v6, %v1348_v5 }
 0xd77   : > { %v1358_v10 = vadd.f32 %v1694_v7, %v1351_v9 }
 0xd79   : > { %v1359_v11 = vpack.c.bf16 %v1358_v10, %v1358_v10 }
 0xd7b   : > { %1829 = vmatmul.mubr.msk.bf16.vlgmr.msra.gmra.mrb[28].mxu1 %vm560_vm0, %v1359_v11 }
 0xe4e   : > { %v1420_v15 = vpop.f32.mrb[28].mxu1 }
 0xe4f   : > { %v1421_v16 = vadd.f32 %v1695_v14, %v1420_v15  ;;  %v1830_v17 = vpop.f32.mrb[29].mxu1 }
 0xe50   : > { %v1423_v18 = vpop.f32.mrb[30].mxu1 }
 0xe51   : > { %v1426_v19 = vmax.f32 %v1421_v16, 0.0  ;;  %v1831_v20 = vpop.f32.mrb[31].mxu1 }
 0xe53   : > { %v1427_v21 = vpack.c.bf16 %v1426_v19, %v1426_v19 }
 0xe55   : > { %1841 = vmatmul.mubr.msk.bf16.vlgmr.msra.gmra.mrb[24].mxu0 %vm1467_vm8, %v1427_v21 }
 0xf28   : > { %v1505_v22 = vpop.f32.mrb[24].mxu0 }
 0xf29   : > { %v1506_v23 = vadd.f32 %v1699_v8, %v1505_v22  ;;  %v1842_v24 = vpop.f32.mrb[25].mxu0 }
 0xf2a   : > { %v1508_v43 = vpop.f32.mrb[26].mxu0 }
 0xf2b   : > { %v1511_v25 = vadd.f32 %v1506_v23, %v2680_v49  ;;  %v1843_v26 = vpop.f32.mrb[27].mxu0 }
 0xf2d   : > { %1512 = vst.msk [vmem:[%s545_s26] sm:$0xff] %vm560_vm0, %v1511_v25 }
 0xf2e   : > { %2170 = shalt.err (!%p2167_p6)
}
 0xf2f   : > { %s2171_s16 = scalar_lea.hbm %s2721_s18, 128  ;;  %s2175_s25 = scalar_lea.hbm %s2816_s27, 256 }
 0xf30   : > { %p2172_p5 = scmp.ne.s32.totalorder %s2721_s18, %s2171_s16  ;;  %p2176_p10 = scmp.lt.u32.totalorder %s2721_s18, %s2816_s27 }
 0xf31   : > { %p2177_p2 = scmp.lt.u32.totalorder %s2175_s25, %s2171_s16  ;;  %p2179_p4 = scmp.lt.u32.totalorder %s2171_s16, %s2721_s18 }
 0xf32   : > { %p2173_p9 = pnand %p2172_p5, %p2817_p7 }
 0xf33   : > { %p2178_p3 = por %p2177_p2, %p2176_p10 }
 0xf34   : > { %p2174_p12 = pneg %p2173_p9 }
 0xf35   : > { %p2180_p8 = por %p2179_p4, %p2178_p3 }
 0xf37   : > { %p2181_p11 = pnand %p2180_p8, %p2174_p12 }
 0xf39   : > { %2184 = shalt.err (!%p2181_p11)
}
 0xf3a   : > { %1868 = dma.vmem_to_hbm [thread:$0]  (%p2817_p7), %s2723_s3, 128, %s2721_s18, %s1514_s17  }
 0xf3b PF: > { %s2818_s15 = sld [smem:[#allocation21_spill]]  ;;  %s2819_s29 = sld [smem:[#allocation19_spill]] }
 0xf3c   : > { %s2820_s14 = sld [smem:[#allocation25_spill]] }
 0xf41   : > { %p1905_p13 = scmp.ge.s32.totalorder %s2818_s15, 2  ;;  %s1539_s23 = sand.u32 1, %s2819_s29  }
 0xf42   : > { %p2821_p1 = scmp.ne.s32.totalorder %s2820_s14, 0  ;;  %s1540_s22 = scalar_lea.sflag [#allocation4], %s1539_s23 }
 0xf44   : > { %p1890_p0 = pnand %p1905_p13, %p2821_p1 }
 0xf46   : > { %2218 = dma.done.wait (!%p1890_p0), %s1540_s22, 128  }
 0xf47   : > { %2220 = vsyncadd (!%p1890_p0), %s1540_s22, 4294967168  ;;  %s2822_s16 = sld [smem:[#allocation22_spill]]  ;;  %s2823_s21 = sld [smem:[#allocation20_spill]] }
 0xf48   : > { %s2824_s15 = sld [smem:[#allocation23_spill]]  ;;  %s2825_s29 = smov %s2227_s30 }
 0xf4d   : > { %p28_p6 = scmp.ge.s32.totalorder %s2822_s16, 4   ;;  %s2826_s30 = smov %s2823_s21 }
 0xf4f   :  { %30 = sbr.rel (!%p28_p6) target bundleno = 10 (0xa), region = 139 }
 0xf56   :  { %1545 = vsyncpa [#allocation3], 1 }
 0xf57   :  { %1547 = vsyncpa [#allocation3 + $0x1], 1 }
 0xf58   :  { %1548 = vsyncpa [#allocation6], 1 }
 0xf59   :  { %1549 = vsyncpa [#allocation9], 1 }
 0xf5a   :  { %1550 = vsyncpa [#allocation12], 1 }
 0xf5b   :  { %1551 = vsyncpa [#allocation4], 1 }
 0xf5c   :  { %1553 = vsyncpa [#allocation4 + $0x1], 1 }

// kernel: tpu_custom_call.1
= control target key start
LH: loop header
LB: loop body
LE: loop exit
PB: predicated region body
PF: predicated region fallthrough
CT: control target
= control target key end

     0   :  { %s2764_s0 = inlined_call_operand.vmem [shape: f32[2,8,32], index: 0, kind: input, shape index: {}]   ;;  %s2765_s1 = inlined_call_operand.vmem [shape: f32[2,1,8], index: 1, kind: input, shape index: {}]   ;;  %s2766_s2 = inlined_call_operand.hbm [shape: f32[1,32], index: 2, kind: input, shape index: {}]   ;;  %s2767_s3 = inlined_call_operand.hbm [shape: f32[1,32], index: 3, kind: input, shape index: {}]   ;;  %s2768_s4 = inlined_call_operand.vmem [shape: bf16[32,96], index: 4, kind: input, shape index: {}]   ;;  %s2769_s5 = inlined_call_operand.hbm [shape: f32[1,96], index: 5, kind: input, shape index: {}]   ;;  %s2770_s6 = inlined_call_operand.vmem [shape: bf16[32,32], index: 6, kind: input, shape index: {}]   ;;  %s2771_s7 = inlined_call_operand.hbm [shape: f32[1,32], index: 7, kind: input, shape index: {}]   ;;  %s2772_s8 = inlined_call_operand.hbm [shape: f32[1,32], index: 8, kind: input, shape index: {}]   ;;  %s2773_s9 = inlined_call_operand.hbm [shape: f32[1,32], index: 9, kind: input, shape index: {}]   ;;  %s2774_s10 = inlined_call_operand.vmem [shape: bf16[32,64], index: 10, kind: input, shape index: {}]   ;;  %s2775_s11 = inlined_call_operand.vmem [shape: f32[1,64], index: 11, kind: input, shape index: {}]   ;;  %s2776_s12 = inlined_call_operand.vmem [shape: bf16[64,32], index: 12, kind: input, shape index: {}]   ;;  %s2777_s13 = inlined_call_operand.vmem [shape: f32[1,32], index: 13, kind: input, shape index: {}]   ;;  %s2778_s14 = inlined_call_operand.hbm [shape: f32[2,8,32], index: 14, kind: output, shape index: {}]  }
   0x1   :  { %2791 = sst [smem:[#allocation26_spill]] %s2767_s3 }
   0x2   :  { %2792 = sst [smem:[#allocation27_spill]] %s2778_s14 }
   0x3   :  { %19 = vsyncpa [#allocation3], 0 }
   0x4   :  { %20 = vsyncpa [#allocation6], 0 }
   0x5   :  { %21 = vsyncpa [#allocation9], 0 }
   0x6   :  { %22 = vsyncpa [#allocation12], 0 }
   0x7   :  { %23 = vsyncpa [#allocation4], 0 }
   0x8   :  { %25 = vsyncpa [#allocation4 + $0x1], 0  ;;  %s2332_s29 = smov 0   ;;  %s2334_s30 = smov 0  }
   0x9   :  { %s2336_s15 = smov 0   ;;  %s2338_s16 = smov 0  }
   0xa LB: > { %2793 = sst [smem:[#allocation19_spill]] %s2223_s29  ;;  %s2353_s17 = sadd.s32 4294967295, %s2235_s16   ;;  %s2235_s16 = sphi %s2338_s16, %s2822_s16   ;;  %s2231_s15 = sphi %s2336_s15, %s2824_s15   ;;  %s2227_s30 = sphi %s2334_s30, %s2826_s30   ;;  %s2223_s29 = sphi %s2332_s29, %s2825_s29  }
   0xb   : > { %2794 = sst [smem:[#allocation20_spill]] %s2231_s15  ;;  %s1655_s18 = sadd.s32 4294967294, %s2235_s16  }
   0xc   : > { %2795 = sst [smem:[#allocation21_spill]] %s2235_s16  ;;  %s2357_s19 = sadd.s32 1, %s2235_s16  }
   0xd   : > { %2796 = sst [smem:[#allocation22_spill]] %s2357_s19  ;;  %s342_s20 = sadd.s32 1, %s2231_s15 }
   0xe   : > { %s339_s21 = ssub.s32 %s2235_s16, %s2357_s19  ;;  %p352_p0 = scmp.ne.s32.totalorder %s2231_s15, %s2227_s30 }
   0xf   : > { %p340_p1 = scmp.eq.s32.totalorder %s339_s21, 0  ;;  %p353_p2 = scmp.eq.s32.totalorder %s2353_s17, 1 }
  0x10   : > { %p358_p3 = scmp.ne.s32.totalorder %s2227_s30, %s2223_s29  ;;  %p359_p4 = scmp.eq.s32.totalorder %s1655_s18, 1 }
  0x11   : > { %s2368_s22 = scalar_select %p340_p1, %s2231_s15, %s342_s20  }
  0x12   : > { %p2370_p5 = por %p353_p2, %p352_p0  ;;  %p2374_p6 = por %p359_p4, %p358_p3 }
  0x13   : > { %2797 = sst [smem:[#allocation23_spill]] %s2368_s22  ;;  %p1656_p7 = scmp.ge.s32.totalorder %s2235_s16, 1 }
  0x14   : > { %s2798_s23 = scalar_select %p2370_p5, 1, 0 }
  0x15   : > { %s2800_s24 = scalar_select %p2374_p6, 1, 0 }
  0x16   : > { %2799 = sst [smem:[#allocation24_spill]] %s2798_s23  ;;  %p366_p8 = scmp.lt.s32.totalorder %s2235_s16, 3 }
  0x17   : > { %2801 = sst [smem:[#allocation25_spill]] %s2800_s24  ;;  %p2785_p9 = scmp.eq.s32.totalorder %s2353_s17, 0 }
  0x18   : > { %p2381_p10 = pnand %p1656_p7, %p366_p8  ;;  %s2237_s26 = smov [#allocation5]  }
  0x19   : > { %s390_s27 = sshll.u32 %s2237_s26, 4  ;;  %s2238_s28 = smov [#allocation8]   ;;  %s391_s27 = int_to_ptr.vmem [resolvable:$true] %s390_s27 }
  0x1a   : > { %s2802_s25 = scalar_select %p2381_p10, 1, 0 }
  0x1b   : > { %p1870_p11 = pneg %p2381_p10  ;;  %s418_s18 = sshll.u32 %s2238_s28, 4  ;;  %s2393_s18 = int_to_ptr.vmem [resolvable:$true] %s418_s18 }
  0x1c   : > { %s2239_s21 = smov [#allocation2]   ;;  %s2804_s3 = sld [smem:[#allocation26_spill]] }
  0x1d   : > { %p2389_p12 = pnand %p2785_p9, %p1870_p11  ;;  %s379_s22 = sshll.u32 %s2239_s21, 4  ;;  %s2395_s22 = int_to_ptr.vmem [resolvable:$true] %s379_s22 }
  0x1f   : > { %p2405_p0 = pneg %p2389_p12 }
  0x22   : > { %s1989_s26 = scalar_lea.hbm %s2804_s3, 16 }
  0x23   : > { %p1990_p13 = scmp.ne.s32.totalorder %s2804_s3, %s1989_s26  ;;  %p1996_p3 = scmp.lt.u32.totalorder %s1989_s26, %s2804_s3 }
  0x25   : > { %p1992_p1 = pnand %p2405_p0, %p1990_p13 }
  0x27   : > { %p1993_p2 = pneg %p1992_p1 }
  0x29   : > { %p1998_p4 = pnand %p1996_p3, %p1993_p2 }
  0x2b   : > { %2001 = shalt.err (!%p1998_p4)
}
  0x2c   : > { %s2002_s15 = scalar_lea.vmem %s391_s27, 16  ;;  %s2009_s29 = scalar_lea.vmem %s391_s27, 32 }
  0x2d   : > { %p2003_p7 = scmp.ne.s32.totalorder %s391_s27, %s2002_s15  ;;  %p2010_p9 = scmp.lt.s32.totalorder %s391_s27, %s391_s27 }
  0x2e   : > { %p2011_p6 = scmp.lt.s32.totalorder %s2009_s29, %s2002_s15 }
  0x2f   : > { %p2005_p8 = pnand %p2003_p7, %p2405_p0 }
  0x30   : > { %p2012_p5 = por %p2011_p6, %p2010_p9 }
  0x31   : > { %p2006_p11 = pneg %p2005_p8 }
  0x33   : > { %p2013_p10 = pnand %p2012_p5, %p2006_p11 }
  0x35   : > { %2016 = shalt.err (!%p2013_p10)
}
  0x36   : > { %1876 = dma.hbm_to_vmem [thread:$0]  (!%p2389_p12), %s2804_s3, 16, %s391_s27, [#allocation6]  }
  0x37   : > { %s2017_s21 = scalar_lea.hbm %s2771_s7, 16 }
  0x38   : > { %p2018_p13 = scmp.ne.s32.totalorder %s2771_s7, %s2017_s21  ;;  %p2024_p5 = scmp.lt.u32.totalorder %s2017_s21, %s2771_s7 }
  0x3a   : > { %p2020_p1 = pnand %p2018_p13, %p2405_p0 }
  0x3c   : > { %p2021_p6 = pneg %p2020_p1 }
  0x3e   : > { %p2026_p9 = pnand %p2024_p5, %p2021_p6 }
  0x40   : > { %2029 = shalt.err (!%p2026_p9)
}
  0x41   : > { %s2030_s27 = scalar_lea.vmem %s2393_s18, 16  ;;  %s2037_s14 = scalar_lea.vmem %s2393_s18, 32 }
  0x42   : > { %p2031_p10 = scmp.ne.s32.totalorder %s2393_s18, %s2030_s27  ;;  %p2038_p4 = scmp.lt.s32.totalorder %s2393_s18, %s2393_s18 }
  0x43   : > { %p2039_p7 = scmp.lt.s32.totalorder %s2037_s14, %s2030_s27 }
  0x44   : > { %p2033_p2 = pnand %p2031_p10, %p2405_p0 }
  0x45   : > { %p2040_p8 = por %p2039_p7, %p2038_p4 }
  0x46   : > { %p2034_p3 = pneg %p2033_p2 }
  0x48   : > { %p2041_p11 = pnand %p2040_p8, %p2034_p3 }
  0x4a   : > { %2044 = shalt.err (!%p2041_p11)
}
  0x4b   : > { %1882 = dma.hbm_to_vmem [thread:$0]  (!%p2389_p12), %s2771_s7, 16, %s2393_s18, [#allocation9]  }
  0x4c   : > { %s2045_s26 = scalar_lea.hbm %s2766_s2, 16 }
  0x4d   : > { %p2046_p13 = scmp.ne.s32.totalorder %s2766_s2, %s2045_s26  ;;  %p2052_p5 = scmp.lt.u32.totalorder %s2045_s26, %s2766_s2 }
  0x4f   : > { %p2048_p1 = pnand %p2046_p13, %p2405_p0 }
  0x51   : > { %p2049_p6 = pneg %p2048_p1 }
  0x53   : > { %p2054_p9 = pnand %p2052_p5, %p2049_p6 }
  0x55   : > { %2057 = shalt.err (!%p2054_p9)
}
  0x56   : > { %s2058_s18 = scalar_lea.vmem %s2395_s22, 16  ;;  %s2065_s14 = scalar_lea.vmem %s2395_s22, 32 }
  0x57   : > { %p2059_p10 = scmp.ne.s32.totalorder %s2395_s22, %s2058_s18  ;;  %p2066_p4 = scmp.lt.s32.totalorder %s2395_s22, %s2395_s22 }
  0x58   : > { %p2067_p7 = scmp.lt.s32.totalorder %s2065_s14, %s2058_s18 }
  0x59   : > { %p2061_p2 = pnand %p2059_p10, %p2405_p0 }
  0x5a   : > { %p2068_p8 = por %p2067_p7, %p2066_p4 }
  0x5b   : > { %p2062_p3 = pneg %p2061_p2 }
  0x5d   : > { %p2069_p11 = pnand %p2068_p8, %p2062_p3 }
  0x5f   : > { %2072 = shalt.err (!%p2069_p11)
}
  0x60   : > { %1873 = dma.hbm_to_vmem [thread:$0]  (!%p2389_p12), %s2766_s2, 16, %s2395_s22, [#allocation3]  }
  0x61   : > { %s2240_s24 = smov [#allocation7]   ;;  %s2241_s26 = smov [#allocation10]  }
  0x62   : > { %s404_s16 = sshll.u32 %s2240_s24, 4  ;;  %s429_s21 = sshll.u32 %s2241_s26, 4  ;;  %s405_s16 = int_to_ptr.vmem [resolvable:$true] %s404_s16  ;;  %s430_s21 = int_to_ptr.vmem [resolvable:$true] %s429_s21 }
  0x63   : > { %s2073_s27 = scalar_lea.hbm %s2769_s5, 16 }
  0x64   : > { %p2074_p13 = scmp.ne.s32.totalorder %s2769_s5, %s2073_s27  ;;  %p2080_p5 = scmp.lt.u32.totalorder %s2073_s27, %s2769_s5 }
  0x66   : > { %p2076_p1 = pnand %p2074_p13, %p2405_p0 }
  0x68   : > { %p2077_p6 = pneg %p2076_p1 }
  0x6a   : > { %p2082_p9 = pnand %p2080_p5, %p2077_p6 }
  0x6c   : > { %2085 = shalt.err (!%p2082_p9)
}
  0x6d   : > { %s2086_s22 = scalar_lea.vmem %s405_s16, 16  ;;  %s2093_s19 = scalar_lea.vmem %s405_s16, 32 }
  0x6e   : > { %p2087_p10 = scmp.ne.s32.totalorder %s405_s16, %s2086_s22  ;;  %p2094_p4 = scmp.lt.s32.totalorder %s405_s16, %s405_s16 }
  0x6f   : > { %p2095_p7 = scmp.lt.s32.totalorder %s2093_s19, %s2086_s22 }
  0x70   : > { %p2089_p2 = pnand %p2087_p10, %p2405_p0 }
  0x71   : > { %p2096_p8 = por %p2095_p7, %p2094_p4 }
  0x72   : > { %p2090_p3 = pneg %p2089_p2 }
  0x74   : > { %p2097_p11 = pnand %p2096_p8, %p2090_p3 }
  0x76   : > { %2100 = shalt.err (!%p2097_p11)
}
  0x77   : > { %1879 = dma.hbm_to_vmem [thread:$0]  (!%p2389_p12), %s2769_s5, 16, %s405_s16, [#allocation6]  }
  0x78   : > { %s2101_s29 = scalar_lea.hbm %s2772_s8, 16 }
  0x79   : > { %p2102_p13 = scmp.ne.s32.totalorder %s2772_s8, %s2101_s29  ;;  %p2108_p5 = scmp.lt.u32.totalorder %s2101_s29, %s2772_s8 }
  0x7b   : > { %p2104_p1 = pnand %p2102_p13, %p2405_p0 }
  0x7d   : > { %p2105_p6 = pneg %p2104_p1 }
  0x7f   : > { %p2110_p9 = pnand %p2108_p5, %p2105_p6 }
  0x81   : > { %2113 = shalt.err (!%p2110_p9)
}
  0x82   : > { %s2114_s22 = scalar_lea.vmem %s430_s21, 16  ;;  %s2121_s16 = scalar_lea.vmem %s430_s21, 32 }
  0x83   : > { %p2115_p10 = scmp.ne.s32.totalorder %s430_s21, %s2114_s22  ;;  %p2122_p4 = scmp.lt.s32.totalorder %s430_s21, %s430_s21 }
  0x84   : > { %p2123_p7 = scmp.lt.s32.totalorder %s2121_s16, %s2114_s22 }
  0x85   : > { %p2117_p2 = pnand %p2115_p10, %p2405_p0 }
  0x86   : > { %p2124_p8 = por %p2123_p7, %p2122_p4 }
  0x87   : > { %p2118_p3 = pneg %p2117_p2 }
  0x89   : > { %p2125_p11 = pnand %p2124_p8, %p2118_p3 }
  0x8b   : > { %2128 = shalt.err (!%p2125_p11)
}
  0x8c   : > { %1885 = dma.hbm_to_vmem [thread:$0]  (!%p2389_p12), %s2772_s8, 16, %s430_s21, [#allocation9]  }
  0x8d   : > { %s2242_s26 = smov [#allocation11]   ;;  %s2129_s27 = scalar_lea.hbm %s2773_s9, 16 }
  0x8e   : > { %s440_s3 = sshll.u32 %s2242_s26, 4  ;;  %p2130_p13 = scmp.ne.s32.totalorder %s2773_s9, %s2129_s27  ;;  %s441_s3 = int_to_ptr.vmem [resolvable:$true] %s440_s3 }
  0x8f   : > { %p2136_p5 = scmp.lt.u32.totalorder %s2129_s27, %s2773_s9 }
  0x90   : > { %p2132_p1 = pnand %p2130_p13, %p2405_p0 }
  0x92   : > { %p2133_p6 = pneg %p2132_p1 }
  0x94   : > { %p2138_p9 = pnand %p2136_p5, %p2133_p6 }
  0x96   : > { %2141 = shalt.err (!%p2138_p9)
}
  0x97   : > { %s2142_s21 = scalar_lea.vmem %s441_s3, 16  ;;  %s2149_s16 = scalar_lea.vmem %s441_s3, 32 }
  0x98   : > { %p2143_p10 = scmp.ne.s32.totalorder %s441_s3, %s2142_s21  ;;  %p2150_p4 = scmp.lt.s32.totalorder %s441_s3, %s441_s3 }
  0x99   : > { %p2151_p7 = scmp.lt.s32.totalorder %s2149_s16, %s2142_s21 }
  0x9a   : > { %p2145_p2 = pnand %p2143_p10, %p2405_p0 }
  0x9b   : > { %p2152_p8 = por %p2151_p7, %p2150_p4 }
  0x9c   : > { %p2146_p3 = pneg %p2145_p2 }
  0x9e   : > { %p2153_p11 = pnand %p2152_p8, %p2146_p3 }
  0xa0   : > { %2156 = shalt.err (!%p2153_p11)
}
  0xa1   : > { %1888 = dma.hbm_to_vmem [thread:$0]  (!%p2389_p12), %s2773_s9, 16, %s441_s3, [#allocation12]  }
  0xa2   : > { %p2806_p13 = scmp.ne.s32.totalorder %s2802_s25, 0 }
  0xa3   : > { %p2807_p1 = scmp.eq.s32.totalorder (!%p2806_p13), %s2353_s17, 0 }
  0xa4   : > { %478 = sbr.rel (%p2806_p13) target bundleno = 3899 (0xf3b), region = 76 }
  0xab   : > { %2202 = dma.done.wait (%p2807_p1), [#allocation3], 16   ;;  %p2808_p0 = pmov %p2807_p1 }
  0xad   : > { %2204 = vsyncadd (%p2808_p0), [#allocation3], 4294967280  ;;  %p2809_p6 = pmov %p2808_p0 }
  0xae   : > { %p2810_p5 = pmov %p2808_p0 }
  0xaf   : > { %2206 = dma.done.wait (%p2809_p6), [#allocation6], 32  }
  0xb0   : > { %2208 = vsyncadd (%p2810_p5), [#allocation6], 4294967264  ;;  %p2811_p9 = pmov %p2808_p0 }
  0xb1   : > { %p2812_p12 = pmov %p2808_p0 }
  0xb2   : > { %2210 = dma.done.wait (%p2811_p9), [#allocation9], 32  }
  0xb3   : > { %2212 = vsyncadd (%p2812_p12), [#allocation9], 4294967264  ;;  %p2813_p10 = pmov %p2808_p0 }
  0xb4   : > { %p2814_p2 = pmov %p2808_p0 }
  0xb5   : > { %2214 = dma.done.wait (%p2813_p10), [#allocation12], 16  }
  0xb6   : > { %2216 = vsyncadd (%p2814_p2), [#allocation12], 4294967280  ;;  %p546_p3 = scmp.lt.s32.totalorder %s2353_s17, 1  ;;  %vm560_vm0 = vcmask 261120   ;;  %v1957_v7 = vld [vmem:[%s2768_s4] sm:$0xff]   ;;  %v2243_v8 = vmov 0.0   ;;  %v721_v37 = vlaneseq }
  0xb7   : > { %1744 = vmatprep.subr.bf16.mxu1 %v2243_v8  ;;  %vm2244_vm1 = vmmov 0   ;;  %v1958_v9 = vld [vmem:[%s2768_s4 + $0x8] sm:$0xff]   ;;  %1758 = vmatprep.subr.bf16.mxu0 %v2243_v8  ;;  %v1674_v18 = vld [vmem:[#allocation2] ss:$0 sm:$0xff]  ;;  %v1675_v21 = vld [vmem:[#allocation5] ss:$0 sm:$0xff] }
  0xb8   : > { %s2543_s25 = scalar_select %p546_p3, %s2353_s17, 1  ;;  %1748 = vmatprep.mubr.msk.bf16.mxu1 %vm2244_vm1, %v2243_v8  ;;  %1745 = vmatpush3.bf16.msra.mxu1 %v1957_v7  ;;  %v1676_v25 = vld [vmem:[#allocation7] ss:$0 sm:$0xff]  ;;  %vm672_vm4 = vcmask 64512   ;;  %v722_v40 = vshrl.u32 %v721_v37, 7  ;;  %vm744_vm5 = vcmask 1043456  }
  0xb9   : > { %1746 = vmatprep.subr.bf16.mxu1 %v2243_v8  ;;  %1760 = vmatprep.mubr.msk.bf16.mxu0 %vm2244_vm1, %v2243_v8  ;;  %s2245_s14 = smov 120   ;;  %s2246_s23 = smov 96   ;;  %vm1467_vm8 = vcmask 523264  }
  0xba   : > { %s1672_s20 = sshll.u32 %s2543_s25, 3  ;;  %s2247_s22 = smov 88   ;;  %v723_v42 = vsub.s32 0, %v722_v40 }
  0xbb   : > { %s549_s3 = scalar_lea.vmem %s2764_s0, %s1672_s20  ;;  %s552_s19 = scalar_lea.vmem %s2765_s1, %s2543_s25 }
  0xbc   : > { %v2549_v0 = vld [vmem:[%s549_s3] sm:$0xff]  ;;  %1747 = vmatpush3.bf16.msra.mxu1 %v1958_v9  ;;  %s2248_s24 = smov 56   ;;  %s2249_s25 = smov 64  }
  0xbd   : > { %v561_v1 = vsel %vm560_vm0, %v2549_v0, 0.0  ;;  %1752 = vmatprep.subr.bf16.mxu1 %v2243_v8  ;;  %v555_v38 = vld [vmem:[%s552_s19] sm:$0x1]  ;;  %s2250_s20 = smov 80   ;;  %s2251_s28 = smov 112  }
  0xbe   : > { %562 = vadd.xlane.f32.xlu0 %v561_v1  ;;  %v1673_v39 = vadd.f32 -1.0, %v555_v38  ;;  %s2252_s27 = smov 48   ;;  %s2253_s18 = smov 104  }
  0xbf   : > { %s2255_s21 = smov 40   ;;  %s543_s16 = sand.u32 1, %s2227_s30  }
  0xc0   : > { %v557_v41 = vmul.f32 1e+09, %v1673_v39  ;;  %s1671_s19 = sshll.u32 %s543_s16, 3 }
  0xc1   : > { %s545_s26 = scalar_lea.vmem [#allocation13], %s1671_s19 }
  0xc2   : > { %v2592_v43 = vrot.slane %v557_v41, %v723_v42  ;;  %s1527_s3 = sshll.u32 %s545_s26, 4  ;;  %s2723_s3 = int_to_ptr.vmem [resolvable:$true] %s1527_s3 }
 0x14b   : > { %v563_v2 = vpop.xlane.xlu0 %562 }
 0x14c   : > { %v565_v3 = vmul.f32 0.03125, %v563_v2 }
 0x14e   : > { %v566_v4 = vsub.f32 %v2549_v0, %v565_v3 }
 0x150   : > { %v567_v5 = vmul.f32 %v566_v4, %v566_v4  ;;  %v586_v19 = vmul.f32 %v1674_v18, %v566_v4  ;;  %v664_v18 = vld [vmem:[%s2770_s6] sm:$0xf] }
 0x152   : > { %v568_v6 = vsel %vm560_vm0, %v567_v5, 0.0 }
 0x153   : > { %569 = vadd.xlane.f32.xlu0 %v568_v6 }
 0x1e0   : > { %v570_v10 = vpop.xlane.xlu0 %569 }
 0x1e1   : > { %v572_v11 = vmul.f32 0.032258064, %v570_v10 }
 0x1e3   : > { %1965 = vrsqrt.f32 %v572_v11  ;;  %vm575_vm2 = vcmp.eq.f32.partialorder %v572_v11, inf  ;;  %v578_v14 = vand.u32 2147483648, %v572_v11  ;;  %vm577_vm3 = vcmp.eq.f32.partialorder %v572_v11, 0.0 }
 0x1ed   : > { %v1966_v12 = vpop.eup %1965 }
 0x1ee   : > { %v574_v13 = vmul.f32 %v1966_v12, %v572_v11 }
 0x1f0   : > { %v576_v15 = vsel %vm575_vm2, %v572_v11, %v574_v13 }
 0x1f1   : > { %v579_v16 = vsel %vm577_vm3, %v578_v14, %v576_v15 }
 0x1f2   : > { %v587_v17 = vadd.f32 1e-06, %v579_v16 }
 0x1f4   : > { %1967 = vrcp.f32 %v587_v17 }
 0x1fe   : > { %v1968_v20 = vpop.eup %1967 }
 0x1ff   : > { %v589_v22 = vmul.f32 %v1968_v20, %v586_v19  ;;  %v952_v19 = vsel %vm744_vm5, %v664_v18, 0  ;;  %v665_v20 = vld [vmem:[%s2770_s6 + $0x4] sm:$0xf] }
 0x201   : > { %v596_v23 = vadd.f32 %v1675_v21, %v589_v22  ;;  %v906_v21 = vsel %vm744_vm5, %v665_v20, 0 }
 0x203   : > { %v597_v24 = vpack.c.bf16 %v596_v23, %v596_v23 }
 0x205   : > { %1749 = vmatmul.mubr.msk.bf16.vlgmr.msra.gmra.mrb[0].mxu1 %vm560_vm0, %v597_v24 }
 0x206   : > { %1754 = vmatprep.mubr.msk.bf16.mxu1 %vm2244_vm1, %v2243_v8 }
 0x2d8   : > { %v658_v26 = vpop.f32.mrb[0].mxu1 }
 0x2d9   : > { %v659_v27 = vadd.f32 %v1676_v25, %v658_v26  ;;  %v1750_v28 = vpop.f32.mrb[1].mxu1 }
 0x2da   : > { %v661_v29 = vpop.f32.mrb[2].mxu1 }
 0x2db   : > { %v2572_v30 = vpack.c.bf16 %v659_v27, %v659_v27  ;;  %v1751_v31 = vpop.f32.mrb[3].mxu1 }
 0x2dd   : > { %789 = vrot.lane.b32.xlu0 %v2572_v30, %s2245_s14  ;;  %670 = vrot.lane.b32.xlu1 %v2572_v30, %s2246_s23  ;;  %s2254_s14 = smov 72   ;;  %s2256_s23 = smov [#allocation13]  }
 0x2e1   : > { %791 = vrot.lane.b32.xlu1 %v2572_v30, %s2247_s22  ;;  %s2161_s22 = sshll.u32 %s2256_s23, 4  ;;  %s2162_s22 = int_to_ptr.vmem [resolvable:$false] %s2161_s22 }
 0x2e2   : > { %p2164_p13 = scmp.lt.s32.totalorder %s2723_s3, %s2162_s22 }
 0x34f   : > { %v671_v32 = vpop.permute.xlu1 %670  ;;  %v790_v36 = vpop.permute.xlu0 %789 }
 0x350   : > { %v677_v33 = vsel %vm672_vm4, %v671_v32, 0 }
 0x351   : > { %1753 = vmatpush3.bf16.xpose.msra.mxu1 %v677_v33 }
 0x352   : > { %1764 = vmatprep.subr.bf16.mxu1 %v2243_v8 }
 0x353   : > { %v792_v34 = vpop.permute.xlu1 %791 }
 0x354   : > { %v797_v35 = vsel %vm672_vm4, %v792_v34, 0 }
 0x358   : > { %1755 = vmatmul.mubr.msk.bf16.vlgmr.msra.gmra.mrb[4].mxu1 %vm672_vm4, %v2572_v30 }
 0x359   : > { %1765 = vmatpush3.bf16.xpose.msra.mxu1 %v797_v35  ;;  %1766 = vmatprep.mubr.msk.bf16.mxu1 %vm2244_vm1, %v2243_v8 }
 0x35a   : > { %1776 = vmatprep.subr.bf16.mxu1 %v2243_v8 }
 0x360   : > { %1767 = vmatmul.mubr.msk.bf16.vlgmr.msra.gmra.mrb[8].mxu1 %vm672_vm4, %v790_v36 }
 0x361   : > { %1778 = vmatprep.mubr.msk.bf16.mxu1 %vm2244_vm1, %v2243_v8  ;;  %1777 = vmatpush3.bf16.msra.mxu1 %v906_v21 }
 0x362   : > { %1788 = vmatprep.subr.bf16.mxu1 %v2243_v8 }
 0x42b   : > { %v713_v44 = vpop.f32.mrb[4].mxu1 }
 0x42c   : > { %v719_v45 = vmul.f32 0.35355338, %v713_v44  ;;  %v1756_v46 = vpop.f32.mrb[5].mxu1 }
 0x42d   : > { %v716_v47 = vpop.f32.mrb[6].mxu1 }
 0x42e   : > { %v1757_v48 = vpop.f32.mrb[7].mxu1  ;;  %v726_v49 = vadd.f32 %v2592_v43, %v719_v45 }
 0x430   : > { %v727_v50 = vsel %vm672_vm4, %v726_v49, -inf }
 0x431   : > { %728 = vmax.xlane.f32.xlu1 %v727_v50 }
 0x433   : > { %v833_v51 = vpop.f32.mrb[8].mxu1 }
 0x434   : > { %v839_v52 = vmul.f32 0.35355338, %v833_v51  ;;  %v1768_v53 = vpop.f32.mrb[9].mxu1 }
 0x435   : > { %v836_v54 = vpop.f32.mrb[10].mxu1 }
 0x436   : > { %v1769_v55 = vpop.f32.mrb[11].mxu1  ;;  %v840_v56 = vadd.f32 %v839_v52, %v2592_v43 }
 0x438   : > { %v841_v57 = vsel %vm672_vm4, %v840_v56, -inf }
 0x439   : > { %842 = vmax.xlane.f32.xlu0 %v841_v57 }
 0x44f   : > { %853 = vrot.lane.b32.xlu0 %v2572_v30, %s2248_s24 }
 0x4be   : > { %v729_v58 = vpop.xlane.xlu1 %728 }
 0x4bf   : > { %v730_v59 = vsub.f32 %v726_v49, %v729_v58 }
 0x4c1   : > { %v731_v60 = vmul.f32 1.442695, %v730_v59 }
 0x4c3   : > { %1969 = vpow2.f32 %v731_v60 }
 0x4c6   : > { %v843_v61 = vpop.xlane.xlu0 %842 }
 0x4c7   : > { %v844_v62 = vsub.f32 %v840_v56, %v843_v61 }
 0x4c9   : > { %v845_v63 = vmul.f32 1.442695, %v844_v62 }
 0x4ca   : > { %v854_v12 = vpop.permute.xlu0 %853 }
 0x4cb   : > { %1971 = vpow2.f32 %v845_v63  ;;  %v859_v14 = vsel %vm744_vm5, %v854_v12, 0 }
 0x4cd   : > { %v1970_v1 = vpop.eup %1969 }
 0x4ce   : > { %v733_v2 = vsel %vm672_vm4, %v1970_v1, 0.0 }
 0x4cf   : > { %734 = vadd.xlane.f32.xlu1 %v733_v2 }
 0x4d5   : > { %v1972_v3 = vpop.eup %1971 }
 0x4d6   : > { %v847_v4 = vsel %vm672_vm4, %v1972_v3, 0.0 }
 0x4d7   : > { %848 = vadd.xlane.f32.xlu1 %v847_v4  ;;  %v666_v4 = vld [vmem:[%s2770_s6 + $0x8] sm:$0xf] }
 0x4e8   : > { %739 = vrot.lane.b32.xlu1 %v2572_v30, %s2249_s25 }
 0x4ec   : > { %996 = vrot.lane.b32.xlu1 %v2572_v30, %s2250_s20  ;;  %s2815_s20 = sld [smem:[#allocation24_spill]] }
 0x4f0   : > { %994 = vrot.lane.b32.xlu1 %v2572_v30, %s2251_s28  ;;  %s1706_s28 = sshll.u32 %s2353_s17, 7  ;;  %s1514_s17 = scalar_lea.sflag [#allocation4], %s543_s16 }
 0x4f2   : > { %p2817_p7 = scmp.ne.s32.totalorder %s2815_s20, 0 }
 0x55c   : > { %v735_v5 = vpop.xlane.xlu1 %734 }
 0x55d   : > { %1973 = vrcp.f32 %v735_v5  ;;  %v1111_v5 = vsel %vm744_vm5, %v666_v4, 0  ;;  %v1693_v4 = vld [vmem:[#allocation10] ss:$0 sm:$0xff] }
 0x564   : > { %v849_v6 = vpop.xlane.xlu1 %848 }
 0x565   : > { %1975 = vrcp.f32 %v849_v6 }
 0x567   : > { %v1974_v7 = vpop.eup %1973 }
 0x568   : > { %v740_v9 = vpop.permute.xlu1 %739  ;;  %v737_v10 = vmul.f32 %v1974_v7, %v1970_v1 }
 0x569   : > { %v746_v11 = vsel %vm744_vm5, %v740_v9, 0 }
 0x56a   : > { %1759 = vmatpush3.bf16.msra.mxu0 %v746_v11  ;;  %v738_v13 = vpack.c.bf16 %v737_v10, %v737_v10 }
 0x56b   : > { %1770 = vmatprep.subr.bf16.mxu0 %v2243_v8 }
 0x56c   : > { %v997_v27 = vpop.permute.xlu1 %996 }
 0x56d   : > { %1761 = vmatmul.mubr.msk.bf16.vlgmr.msra.gmra.mrb[0].mxu0 %vm672_vm4, %v738_v13  ;;  %v1002_v33 = vsel %vm672_vm4, %v997_v27, 0 }
 0x56e   : > { %1771 = vmatpush3.bf16.msra.mxu0 %v859_v14  ;;  %1772 = vmatprep.mubr.msk.bf16.mxu0 %vm2244_vm1, %v2243_v8 }
 0x56f   : > { %v1976_v15 = vpop.eup %1975  ;;  %1782 = vmatprep.subr.bf16.mxu0 %v2243_v8 }
 0x570   : > { %v851_v16 = vmul.f32 %v1976_v15, %v1972_v3  ;;  %v995_v35 = vpop.permute.xlu1 %994 }
 0x572   : > { %v852_v17 = vpack.c.bf16 %v851_v16, %v851_v16 }
 0x575   : > { %1773 = vmatmul.mubr.msk.bf16.vlgmr.msra.gmra.mrb[4].mxu0 %vm672_vm4, %v852_v17 }
 0x576   : > { %1784 = vmatprep.mubr.msk.bf16.mxu0 %vm2244_vm1, %v2243_v8  ;;  %1783 = vmatpush3.bf16.msra.mxu0 %v952_v19 }
 0x577   : > { %1794 = vmatprep.subr.bf16.mxu0 %v2243_v8 }
 0x640   : > { %v782_v22 = vpop.f32.mrb[0].mxu0 }
 0x641   : > { %v788_v23 = vpack.c.bf16 %v782_v22, %v782_v22  ;;  %v1762_v24 = vpop.f32.mrb[1].mxu0 }
 0x642   : > { %v785_v25 = vpop.f32.mrb[2].mxu0  ;;  %v667_v24 = vld [vmem:[%s2770_s6 + $0xc] sm:$0xf] }
 0x643   : > { %v1763_v26 = vpop.f32.mrb[3].mxu0  ;;  %1785 = vmatmul.mubr.msk.bf16.vlgmr.msra.gmra.mrb[8].mxu0 %vm672_vm4, %v788_v23 }
 0x644   : > { %1796 = vmatprep.mubr.msk.bf16.mxu0 %vm2244_vm1, %v2243_v8 }
 0x648   : > { %v895_v28 = vpop.f32.mrb[4].mxu0 }
 0x649   : > { %v901_v29 = vpack.c.bf16 %v895_v28, %v895_v28  ;;  %v1774_v31 = vpop.f32.mrb[5].mxu0 }
 0x64a   : > { %v898_v32 = vpop.f32.mrb[6].mxu0 }
 0x64b   : > { %v1775_v34 = vpop.f32.mrb[7].mxu0  ;;  %1779 = vmatmul.mubr.msk.bf16.vlgmr.msra.gmra.mrb[12].mxu1 %vm672_vm4, %v901_v29 }
 0x64c   : > { %1789 = vmatpush3.bf16.xpose.msra.mxu1 %v1002_v33  ;;  %1790 = vmatprep.mubr.msk.bf16.mxu1 %vm2244_vm1, %v2243_v8 }
 0x64d   : > { %1800 = vmatprep.subr.bf16.mxu1 %v2243_v8 }
 0x653   : > { %1791 = vmatmul.mubr.msk.bf16.vlgmr.msra.gmra.mrb[16].mxu1 %vm672_vm4, %v995_v35 }
 0x654   : > { %1802 = vmatprep.mubr.msk.bf16.mxu1 %vm2244_vm1, %v2243_v8  ;;  %1801 = vmatpush3.bf16.msra.mxu1 %v1111_v5 }
 0x655   : > { %1812 = vmatprep.subr.bf16.mxu1 %v2243_v8 }
 0x716   : > { %v988_v36 = vpop.f32.mrb[8].mxu0 }
 0x717   : > { %v1786_v37 = vpop.f32.mrb[9].mxu0 }
 0x718   : > { %v991_v38 = vpop.f32.mrb[10].mxu0 }
 0x719   : > { %v1787_v39 = vpop.f32.mrb[11].mxu0 }
 0x71e   : > { %v942_v40 = vpop.f32.mrb[12].mxu1 }
 0x71f   : > { %v2635_v41 = vadd.f32 %v988_v36, %v942_v40  ;;  %v1780_v42 = vpop.f32.mrb[13].mxu1 }
 0x720   : > { %v945_v44 = vpop.f32.mrb[14].mxu1 }
 0x721   : > { %v1781_v45 = vpop.f32.mrb[15].mxu1 }
 0x722   : > { %v1692_v45 = vld [vmem:[#allocation8] ss:$0 sm:$0xff] }
 0x726   : > { %v1038_v46 = vpop.f32.mrb[16].mxu1 }
 0x727   : > { %v1044_v47 = vmul.f32 0.35355338, %v1038_v46  ;;  %v1792_v48 = vpop.f32.mrb[17].mxu1 }
 0x728   : > { %v1041_v49 = vpop.f32.mrb[18].mxu1 }
 0x729   : > { %v1793_v50 = vpop.f32.mrb[19].mxu1  ;;  %v1045_v51 = vadd.f32 %v1044_v47, %v2592_v43 }
 0x72b   : > { %v1046_v52 = vsel %vm672_vm4, %v1045_v51, -inf }
 0x72c   : > { %1047 = vmax.xlane.f32.xlu1 %v1046_v52 }
 0x73d   : > { %1058 = vrot.lane.b32.xlu1 %v2572_v30, %s2252_s27  ;;  %s2816_s27 = sld [smem:[#allocation27_spill]] }
 0x741   : > { %1154 = vrot.lane.b32.xlu1 %v2572_v30, %s2253_s18 }
 0x743   : > { %s2721_s18 = scalar_lea.hbm %s2816_s27, %s1706_s28 }
 0x7b9   : > { %v1048_v53 = vpop.xlane.xlu1 %1047 }
 0x7ba   : > { %v1049_v54 = vsub.f32 %v1045_v51, %v1048_v53 }
 0x7bc   : > { %v1050_v55 = vmul.f32 1.442695, %v1049_v54 }
 0x7bd   : > { %v1059_v56 = vpop.permute.xlu1 %1058 }
 0x7be   : > { %1977 = vpow2.f32 %v1050_v55  ;;  %v1064_v57 = vsel %vm744_vm5, %v1059_v56, 0  ;;  %v1959_v56 = vld [vmem:[%s2774_s10] sm:$0xff]  }
 0x7bf   : > { %1795 = vmatpush3.bf16.msra.mxu0 %v1064_v57  ;;  %v1961_v57 = vld [vmem:[%s2776_s12] sm:$0xff]  }
 0x7c0   : > { %1806 = vmatprep.subr.bf16.mxu0 %v2243_v8 }
 0x7c1   : > { %v1155_v3 = vpop.permute.xlu1 %1154 }
 0x7c8   : > { %v1978_v58 = vpop.eup %1977 }
 0x7c9   : > { %v1052_v59 = vsel %vm672_vm4, %v1978_v58, 0.0 }
 0x7ca   : > { %1053 = vadd.xlane.f32.xlu0 %v1052_v59 }
 0x7e0   : > { %1156 = vrot.lane.b32.xlu0 %v2572_v30, %s2254_s14  ;;  %s2157_s14 = scalar_lea.vmem %s2723_s3, 128 }
 0x7e1   : > { %p2158_p4 = scmp.ne.s32.totalorder %s2723_s3, %s2157_s14 }
 0x7e3   : > { %p2159_p8 = pnand %p2158_p4, %p2817_p7 }
 0x7e5   : > { %p2160_p11 = pneg %p2159_p8 }
 0x857   : > { %v1054_v60 = vpop.xlane.xlu0 %1053 }
 0x858   : > { %1979 = vrcp.f32 %v1054_v60 }
 0x85b   : > { %v1157_v63 = vpop.permute.xlu0 %1156 }
 0x85c   : > { %v1162_v2 = vsel %vm672_vm4, %v1157_v63, 0 }
 0x862   : > { %v1980_v61 = vpop.eup %1979 }
 0x863   : > { %v1056_v62 = vmul.f32 %v1980_v61, %v1978_v58  ;;  %v1962_v58 = vld [vmem:[%s2776_s12 + $0x8] sm:$0xff]  }
 0x865   : > { %v1057_v1 = vpack.c.bf16 %v1056_v62, %v1056_v62 }
 0x867   : > { %1797 = vmatmul.mubr.msk.bf16.vlgmr.msra.gmra.mrb[12].mxu0 %vm672_vm4, %v1057_v1 }
 0x868   : > { %1807 = vmatpush3.bf16.xpose.msra.mxu0 %v1162_v2  ;;  %1808 = vmatprep.mubr.msk.bf16.mxu0 %vm2244_vm1, %v2243_v8 }
 0x869   : > { %1818 = vmatprep.subr.bf16.mxu0 %v2243_v8 }
 0x86f   : > { %1809 = vmatmul.mubr.msk.bf16.vlgmr.msra.gmra.mrb[16].mxu0 %vm672_vm4, %v1155_v3 }
 0x870   : > { %1820 = vmatprep.mubr.msk.bf16.mxu0 %vm2244_vm1, %v2243_v8 }
 0x93a   : > { %v1100_v6 = vpop.f32.mrb[12].mxu0 }
 0x93b   : > { %v1106_v7 = vpack.c.bf16 %v1100_v6, %v1100_v6  ;;  %v1798_v9 = vpop.f32.mrb[13].mxu0 }
 0x93c   : > { %v1103_v10 = vpop.f32.mrb[14].mxu0 }
 0x93d   : > { %v1799_v11 = vpop.f32.mrb[15].mxu0  ;;  %1803 = vmatmul.mubr.msk.bf16.vlgmr.msra.gmra.mrb[20].mxu1 %vm672_vm4, %v1106_v7  ;;  %v1694_v7 = vld [vmem:[#allocation11] ss:$0 sm:$0xff] }
 0x93e   : > { %1814 = vmatprep.mubr.msk.bf16.mxu1 %vm2244_vm1, %v2243_v8 }
 0x942   : > { %v1198_v12 = vpop.f32.mrb[16].mxu0 }
 0x943   : > { %v1204_v13 = vmul.f32 0.35355338, %v1198_v12  ;;  %v1810_v14 = vpop.f32.mrb[17].mxu0  ;;  %v1963_v12 = vld [vmem:[%s2776_s12 + $0x10] sm:$0xff]  }
 0x944   : > { %v1201_v15 = vpop.f32.mrb[18].mxu0  ;;  %v1695_v14 = vld [vmem:[%s2775_s11] ss:$0 sm:$0xff] }
 0x945   : > { %v1811_v16 = vpop.f32.mrb[19].mxu0  ;;  %v1205_v17 = vadd.f32 %v1204_v13, %v2592_v43  ;;  %v1271_v43 = vsel %vm744_vm5, %v667_v24, 0  ;;  %v1964_v13 = vld [vmem:[%s2776_s12 + $0x18] sm:$0xff]  }
 0x946   : > { %1819 = vmatpush3.bf16.msra.mxu0 %v1271_v43 }
 0x947   : > { %v1206_v18 = vsel %vm672_vm4, %v1205_v17, -inf  ;;  %1832 = vmatprep.subr.bf16.mxu0 %v2243_v8 }
 0x948   : > { %1207 = vmax.xlane.f32.xlu1 %v1206_v18 }
 0x9d5   : > { %v1208_v19 = vpop.xlane.xlu1 %1207 }
 0x9d6   : > { %v1209_v20 = vsub.f32 %v1205_v17, %v1208_v19 }
 0x9d8   : > { %v1210_v21 = vmul.f32 1.442695, %v1209_v20 }
 0x9da   : > { %1981 = vpow2.f32 %v1210_v21 }
 0x9e4   : > { %v1982_v22 = vpop.eup %1981 }
 0x9e5   : > { %v1212_v23 = vsel %vm672_vm4, %v1982_v22, 0.0 }
 0x9e6   : > { %1213 = vadd.xlane.f32.xlu0 %v1212_v23 }
 0x9fc   : > { %1218 = vrot.lane.b32.xlu0 %v2572_v30, %s2255_s21  ;;  %s2163_s21 = scalar_lea.vmem %s2162_s22, 256 }
 0x9fd   : > { %p2165_p1 = scmp.lt.s32.totalorder %s2163_s21, %s2157_s14 }
 0x9ff   : > { %p2166_p0 = por %p2165_p1, %p2164_p13 }
 0xa01   : > { %p2167_p6 = pnand %p2166_p0, %p2160_p11 }
 0xa10   : > { %v1147_v25 = vpop.f32.mrb[20].mxu1 }
 0xa11   : > { %v1153_v26 = vadd.f32 %v1147_v25, %v2635_v41  ;;  %v1804_v27 = vpop.f32.mrb[21].mxu1 }
 0xa12   : > { %v1150_v28 = vpop.f32.mrb[22].mxu1 }
 0xa13   : > { %v1805_v29 = vpop.f32.mrb[23].mxu1 }
 0xa73   : > { %v1214_v31 = vpop.xlane.xlu0 %1213 }
 0xa74   : > { %1983 = vrcp.f32 %v1214_v31 }
 0xa77   : > { %v1219_v32 = vpop.permute.xlu0 %1218 }
 0xa78   : > { %v1224_v30 = vsel %vm744_vm5, %v1219_v32, 0 }
 0xa79   : > { %1813 = vmatpush3.bf16.msra.mxu1 %v1224_v30 }
 0xa7a   : > { %1824 = vmatprep.subr.bf16.mxu1 %v2243_v8 }
 0xa7e   : > { %v1984_v33 = vpop.eup %1983 }
 0xa7f   : > { %v1216_v34 = vmul.f32 %v1984_v33, %v1982_v22 }
 0xa81   : > { %v1217_v35 = vpack.c.bf16 %v1216_v34, %v1216_v34 }
 0xa83   : > { %1815 = vmatmul.mubr.msk.bf16.vlgmr.msra.gmra.mrb[24].mxu1 %vm672_vm4, %v1217_v35 }
 0xa84   : > { %1828 = vmatprep.mubr.msk.bf16.mxu1 %vm2244_vm1, %v2243_v8  ;;  %1825 = vmatpush3.bf16.msra.mxu1 %v1959_v56 }
 0xa85   : > { %1826 = vmatprep.subr.bf16.mxu1 %v2243_v8 }
 0xb56   : > { %v1260_v36 = vpop.f32.mrb[24].mxu1 }
 0xb57   : > { %v1266_v37 = vpack.c.bf16 %v1260_v36, %v1260_v36  ;;  %v1816_v38 = vpop.f32.mrb[25].mxu1 }
 0xb58   : > { %v1263_v39 = vpop.f32.mrb[26].mxu1 }
 0xb59   : > { %v1817_v40 = vpop.f32.mrb[27].mxu1  ;;  %1821 = vmatmul.mubr.msk.bf16.vlgmr.msra.gmra.mrb[20].mxu0 %vm672_vm4, %v1266_v37 }
 0xb5a   : > { %1840 = vmatprep.mubr.msk.bf16.mxu0 %vm2244_vm1, %v2243_v8  ;;  %1833 = vmatpush3.bf16.msra.mxu0 %v1961_v57 }
 0xb5b   : > { %1834 = vmatprep.subr.bf16.mxu0 %v2243_v8 }
 0xb5e   : > { %1835 = vmatpush3.bf16.msra.mxu0 %v1962_v58 }
 0xb5f   : > { %1836 = vmatprep.subr.bf16.mxu0 %v2243_v8 }
 0xb62   : > { %1837 = vmatpush3.bf16.msra.mxu0 %v1963_v12 }
 0xb63   : > { %1838 = vmatprep.subr.bf16.mxu0 %v2243_v8  ;;  %v1699_v8 = vld [vmem:[%s2777_s13] ss:$0 sm:$0xff] }
 0xb66   : > { %1839 = vmatpush3.bf16.msra.mxu0 %v1964_v13 }
 0xc2c   : > { %v1307_v41 = vpop.f32.mrb[20].mxu0 }
 0xc2d   : > { %v1313_v42 = vadd.f32 %v1307_v41, %v1153_v26  ;;  %v1822_v44 = vpop.f32.mrb[21].mxu0 }
 0xc2e   : > { %v1310_v46 = vpop.f32.mrb[22].mxu0 }
 0xc2f   : > { %v1314_v47 = vadd.f32 %v1313_v42, %v2549_v0  ;;  %v1823_v48 = vpop.f32.mrb[23].mxu0  ;;  %v1960_v0 = vld [vmem:[%s2774_s10 + $0x8] sm:$0xff]  }
 0xc30   : > { %1827 = vmatpush3.bf16.msra.mxu1 %v1960_v0 }
 0xc31   : > { %v2680_v49 = vadd.f32 %v1692_v45, %v1314_v47 }
 0xc33   : > { %v1325_v50 = vsel %vm560_vm0, %v2680_v49, 0.0 }
 0xc34   : > { %1326 = vadd.xlane.f32.xlu1 %v1325_v50 }
 0xcc1   : > { %v1327_v51 = vpop.xlane.xlu1 %1326 }
 0xcc2   : > { %v1328_v52 = vmul.f32 0.03125, %v1327_v51 }
 0xcc4   : > { %v1329_v53 = vsub.f32 %v2680_v49, %v1328_v52 }
 0xcc6   : > { %v1330_v54 = vmul.f32 %v1329_v53, %v1329_v53  ;;  %v1348_v5 = vmul.f32 %v1693_v4, %v1329_v53 }
 0xcc8   : > { %v1331_v55 = vsel %vm560_vm0, %v1330_v54, 0.0 }
 0xcc9   : > { %1332 = vadd.xlane.f32.xlu1 %v1331_v55 }
 0xd56   : > { %v1333_v59 = vpop.xlane.xlu1 %1332 }
 0xd57   : > { %v1334_v60 = vmul.f32 0.032258064, %v1333_v59 }
 0xd59   : > { %1985 = vrsqrt.f32 %v1334_v60  ;;  %vm1337_vm6 = vcmp.eq.f32.partialorder %v1334_v60, inf  ;;  %v1340_v63 = vand.u32 2147483648, %v1334_v60  ;;  %vm1339_vm7 = vcmp.eq.f32.partialorder %v1334_v60, 0.0 }
 0xd63   : > { %v1986_v61 = vpop.eup %1985 }
 0xd64   : > { %v1336_v62 = vmul.f32 %v1986_v61, %v1334_v60 }
 0xd66   : > { %v1338_v1 = vsel %vm1337_vm6, %v1334_v60, %v1336_v62 }
 0xd67   : > { %v1341_v2 = vsel %vm1339_vm7, %v1340_v63, %v1338_v1 }
 0xd68   : > { %v1349_v3 = vadd.f32 1e-06, %v1341_v2 }
 0xd6a   : > { %1987 = vrcp.f32 %v1349_v3 }
 0xd74   : > { %v1988_v6 = vpop.eup %1987 }
 0xd75   : > { %v1351_v9 = vmul.f32 %v1988_v6, %v1348_v5 }
 0xd77   : > { %v1358_v10 = vadd.f32 %v1694_v7, %v1351_v9 }
 0xd79   : > { %v1359_v11 = vpack.c.bf16 %v1358_v10, %v1358_v10 }
 0xd7b   : > { %1829 = vmatmul.mubr.msk.bf16.vlgmr.msra.gmra.mrb[28].mxu1 %vm560_vm0, %v1359_v11 }
 0xe4e   : > { %v1420_v15 = vpop.f32.mrb[28].mxu1 }
 0xe4f   : > { %v1421_v16 = vadd.f32 %v1695_v14, %v1420_v15  ;;  %v1830_v17 = vpop.f32.mrb[29].mxu1 }
 0xe50   : > { %v1423_v18 = vpop.f32.mrb[30].mxu1 }
 0xe51   : > { %v1426_v19 = vmax.f32 %v1421_v16, 0.0  ;;  %v1831_v20 = vpop.f32.mrb[31].mxu1 }
 0xe53   : > { %v1427_v21 = vpack.c.bf16 %v1426_v19, %v1426_v19 }
 0xe55   : > { %1841 = vmatmul.mubr.msk.bf16.vlgmr.msra.gmra.mrb[24].mxu0 %vm1467_vm8, %v1427_v21 }
 0xf28   : > { %v1505_v22 = vpop.f32.mrb[24].mxu0 }
 0xf29   : > { %v1506_v23 = vadd.f32 %v1699_v8, %v1505_v22  ;;  %v1842_v24 = vpop.f32.mrb[25].mxu0 }
 0xf2a   : > { %v1508_v43 = vpop.f32.mrb[26].mxu0 }
 0xf2b   : > { %v1511_v25 = vadd.f32 %v1506_v23, %v2680_v49  ;;  %v1843_v26 = vpop.f32.mrb[27].mxu0 }
 0xf2d   : > { %1512 = vst.msk [vmem:[%s545_s26] sm:$0xff] %vm560_vm0, %v1511_v25 }
 0xf2e   : > { %2170 = shalt.err (!%p2167_p6)
}
 0xf2f   : > { %s2171_s16 = scalar_lea.hbm %s2721_s18, 128  ;;  %s2175_s25 = scalar_lea.hbm %s2816_s27, 256 }
 0xf30   : > { %p2172_p5 = scmp.ne.s32.totalorder %s2721_s18, %s2171_s16  ;;  %p2176_p10 = scmp.lt.u32.totalorder %s2721_s18, %s2816_s27 }
 0xf31   : > { %p2177_p2 = scmp.lt.u32.totalorder %s2175_s25, %s2171_s16  ;;  %p2179_p4 = scmp.lt.u32.totalorder %s2171_s16, %s2721_s18 }
 0xf32   : > { %p2173_p9 = pnand %p2172_p5, %p2817_p7 }
 0xf33   : > { %p2178_p3 = por %p2177_p2, %p2176_p10 }
 0xf34   : > { %p2174_p12 = pneg %p2173_p9 }
 0xf35   : > { %p2180_p8 = por %p2179_p4, %p2178_p3 }
 0xf37   : > { %p2181_p11 = pnand %p2180_p8, %p2174_p12 }
 0xf39   : > { %2184 = shalt.err (!%p2181_p11)
}
 0xf3a   : > { %1868 = dma.vmem_to_hbm [thread:$0]  (%p2817_p7), %s2723_s3, 128, %s2721_s18, %s1514_s17  }
 0xf3b PF: > { %s2818_s15 = sld [smem:[#allocation21_spill]]  ;;  %s2819_s29 = sld [smem:[#allocation19_spill]] }
 0xf3c   : > { %s2820_s14 = sld [smem:[#allocation25_spill]] }
 0xf41   : > { %p1905_p13 = scmp.ge.s32.totalorder %s2818_s15, 2  ;;  %s1539_s23 = sand.u32 1, %s2819_s29  }
 0xf42   : > { %p2821_p1 = scmp.ne.s32.totalorder %s2820_s14, 0  ;;  %s1540_s22 = scalar_lea.sflag [#allocation4], %s1539_s23 }
 0xf44   : > { %p1890_p0 = pnand %p1905_p13, %p2821_p1 }
 0xf46   : > { %2218 = dma.done.wait (!%p1890_p0), %s1540_s22, 128  }
 0xf47   : > { %2220 = vsyncadd (!%p1890_p0), %s1540_s22, 4294967168  ;;  %s2822_s16 = sld [smem:[#allocation22_spill]]  ;;  %s2823_s21 = sld [smem:[#allocation20_spill]] }
 0xf48   : > { %s2824_s15 = sld [smem:[#allocation23_spill]]  ;;  %s2825_s29 = smov %s2227_s30 }
 0xf4d   : > { %p28_p6 = scmp.ge.s32.totalorder %s2822_s16, 4   ;;  %s2826_s30 = smov %s2823_s21 }
 0xf4f   :  { %30 = sbr.rel (!%p28_p6) target bundleno = 10 (0xa), region = 139 }
 0xf56   :  { %1545 = vsyncpa [#allocation3], 1 }
 0xf57   :  { %1547 = vsyncpa [#allocation3 + $0x1], 1 }
 0xf58   :  { %1548 = vsyncpa [#allocation6], 1 }
 0xf59   :  { %1549 = vsyncpa [#allocation9], 1 }
 0xf5a   :  { %1550 = vsyncpa [#allocation12], 1 }
 0xf5b   :  { %1551 = vsyncpa [#allocation4], 1 }
 0xf5c   :  { %1553 = vsyncpa [#allocation4 + $0x1], 1 }

</bundles_post_ra>
